<compile_context>
chip_gen: v6e
topology: v6e:2x2x1
jax: 0.10.0
libtpu: 0.0.40
codegen_flags: <defaults>
</compile_context>

<pallas_src>
import functools

import jax
import jax.numpy as jnp
from jax import lax
from jax.experimental import pallas as pl
from jax.experimental.pallas import tpu as pltpu

INPUT_SIZE = 10
HIDDEN = 64
OUT_DIM = 3
HP = 128            # per-gate width padded to one full 128-lane tile
GP = 4 * HP         # 512: padded gate dimension [i | f | g | o], 128 lanes each


def lstm_last_kernel(xw_ref, whh_ref, wout_ref, bout_ref, o_ref):
    """xw_ref: (T, B, GP) = x @ W_ih + bias, time-major, gate-padded.
    whh_ref: (HP, GP) zero-padded recurrent weights.
    wout_ref: (HP, OUT_DIM), bout_ref: (1, OUT_DIM)."""
    T, B, _ = xw_ref.shape

    h = jnp.zeros((B, HP), jnp.float32)
    c = jnp.zeros((B, HP), jnp.float32)

    whh = whh_ref[...]  # load once; resident in vregs/VMEM across all steps

    # T is static -> fully unrolled recurrence with static leading-axis loads.
    for t in range(T):
        gates = xw_ref[t] + jnp.dot(h, whh, preferred_element_type=jnp.float32)  # (B, GP)
        # each slice is a whole 128-lane tile -> no cross-lane shuffles
        i_g = jax.nn.sigmoid(gates[:, 0 * HP:1 * HP])
        f_g = jax.nn.sigmoid(gates[:, 1 * HP:2 * HP])
        g_g = jnp.tanh(gates[:, 2 * HP:3 * HP])
        o_g = jax.nn.sigmoid(gates[:, 3 * HP:4 * HP])
        c = f_g * c + i_g * g_g
        h = o_g * jnp.tanh(c)

    # final Linear(64, 3) on the last hidden state (pad rows of W_out are zero)
    o_ref[...] = (jnp.dot(h, wout_ref[...], preferred_element_type=jnp.float32)
                  + bout_ref[...])


def prepare_params(w_ih, w_hh, b_ih, b_hh, w_out, b_out):
    """One-time weight preprocessing (transpose + gate-tile padding)."""
    H = HIDDEN

    def pad_gate_cols(w):  # (..., 4H) -> (..., GP), zero pad each gate to HP lanes
        lead = w.shape[:-1]
        w4 = w.reshape(lead + (4, H))
        w4 = jnp.pad(w4, [(0, 0)] * len(lead) + [(0, 0), (0, HP - H)])
        return w4.reshape(lead + (GP,))

    wih_p = pad_gate_cols(jnp.transpose(w_ih).astype(jnp.float32))          # (I, GP)
    whh_p = pad_gate_cols(jnp.transpose(w_hh).astype(jnp.float32))          # (H, GP)
    whh_p = jnp.pad(whh_p, [(0, HP - H), (0, 0)])                           # (HP, GP)
    bias_p = pad_gate_cols((b_ih + b_hh).astype(jnp.float32)).reshape(1, GP)
    wout_p = jnp.pad(jnp.transpose(w_out).astype(jnp.float32),
                     [(0, HP - H), (0, 0)])                                 # (HP, OUT_DIM)
    bout = b_out.astype(jnp.float32).reshape(1, OUT_DIM)
    return wih_p, whh_p, bias_p, wout_p, bout


@functools.partial(jax.jit, static_argnames=())
def rnn_forward(x, wih_p, whh_p, bias_p, wout_p, bout):
    """x: (B, T, INPUT_SIZE) float32 (PyTorch batch_first convention)."""
    B, T, _ = x.shape
    # Hoisted input projection for all steps: one lane-dense matmul, output
    # time-major (T, B, GP).  Also folds away the (B,T,I)->(T,B,I) transpose.
    xw = jnp.einsum('bti,ig->tbg', x.astype(jnp.float32), wih_p) + bias_p

    return pl.pallas_call(
        lstm_last_kernel,
        out_shape=jax.ShapeDtypeStruct((B, OUT_DIM), jnp.float32),
        grid_spec=pl.GridSpec(
            grid=(1,),
            in_specs=[
                pl.BlockSpec((T, B, GP), lambda i: (0, 0, 0)),
                pl.BlockSpec((HP, GP), lambda i: (0, 0)),
                pl.BlockSpec((HP, OUT_DIM), lambda i: (0, 0)),
                pl.BlockSpec((1, OUT_DIM), lambda i: (0, 0)),
            ],
            out_specs=pl.BlockSpec((B, OUT_DIM), lambda i: (0, 0)),
        ),
        compiler_params=pltpu.CompilerParams(
            dimension_semantics=("arbitrary",)),
    )(xw, whh_p, wout_p, bout)


def rnn_reference(x, w_ih, w_hh, b_ih, b_hh, w_out, b_out):
    """Pure-JAX reference of the PyTorch forward for validation."""
    B, T, _ = x.shape
    H = HIDDEN
    h = jnp.zeros((B, H), jnp.float32)
    c = jnp.zeros((B, H), jnp.float32)
    for t in range(T):
        gates = x[:, t, :] @ w_ih.T + b_ih + h @ w_hh.T + b_hh
        i_g = jax.nn.sigmoid(gates[:, 0 * H:1 * H])
        f_g = jax.nn.sigmoid(gates[:, 1 * H:2 * H])
        g_g = jnp.tanh(gates[:, 2 * H:3 * H])
        o_g = jax.nn.sigmoid(gates[:, 3 * H:4 * H])
        c = f_g * c + i_g * g_g
        h = o_g * jnp.tanh(c)
    return h @ w_out.T + b_out


if __name__ == "__main__":
    key = jax.random.PRNGKey(0)
    kx, k1, k2, k3, k4, k5, k6 = jax.random.split(key, 7)

    B, T = 2, 8
    # PyTorch default init range for LSTM/Linear: U(-1/sqrt(H), 1/sqrt(H))
    bound = 1.0 / jnp.sqrt(jnp.float32(HIDDEN))
    x = jax.random.normal(kx, (B, T, INPUT_SIZE), jnp.float32)
    w_ih = jax.random.uniform(k1, (4 * HIDDEN, INPUT_SIZE), jnp.float32, -bound, bound)
    w_hh = jax.random.uniform(k2, (4 * HIDDEN, HIDDEN), jnp.float32, -bound, bound)
    b_ih = jax.random.uniform(k3, (4 * HIDDEN,), jnp.float32, -bound, bound)
    b_hh = jax.random.uniform(k4, (4 * HIDDEN,), jnp.float32, -bound, bound)
    w_out = jax.random.uniform(k5, (OUT_DIM, HIDDEN), jnp.float32, -bound, bound)
    b_out = jax.random.uniform(k6, (OUT_DIM,), jnp.float32, -bound, bound)

    # one-time weight preprocessing (hoisted out of the per-call path)
    params = prepare_params(w_ih, w_hh, b_ih, b_hh, w_out, b_out)
    params = jax.block_until_ready(params)

    out = rnn_forward(x, *params)
    out = jax.block_until_ready(out)

    ref = rnn_reference(x, w_ih, w_hh, b_ih, b_hh, w_out, b_out)
    assert out.shape == (B, OUT_DIM)
    assert jnp.allclose(out, ref, atol=1e-5, rtol=1e-5), (out, ref)

    print("KERNEL_OK")
</pallas_src>

<mosaic_0001>
module attributes {stable_mosaic.version = 11 : i64} {
  func.func @lstm_last_kernel(%arg0: i32, %arg1: memref<8x2x512xf32, #tpu.memory_space<vmem>>, %arg2: memref<128x512xf32, #tpu.memory_space<vmem>>, %arg3: memref<128x3xf32, #tpu.memory_space<vmem>>, %arg4: memref<1x3xf32, #tpu.memory_space<vmem>>, %arg5: memref<2x3xf32, #tpu.memory_space<vmem>>) attributes {dimension_semantics = [#tpu.dimension_semantics<arbitrary>], iteration_bounds = array<i64: 1>, scalar_prefetch = 0 : i64, scratch_operands = 0 : i64, tpu.core_type = #tpu.core_type<tc>, window_params = [{pipeline_mode = #tpu.pipeline_mode<synchronous>, transform_indices = @transform_0, window_bounds = array<i64: 8, 2, 512>}, {pipeline_mode = #tpu.pipeline_mode<synchronous>, transform_indices = @transform_1, window_bounds = array<i64: 128, 512>}, {pipeline_mode = #tpu.pipeline_mode<synchronous>, transform_indices = @transform_2, window_bounds = array<i64: 128, 3>}, {pipeline_mode = #tpu.pipeline_mode<synchronous>, transform_indices = @transform_3, window_bounds = array<i64: 1, 3>}, {pipeline_mode = #tpu.pipeline_mode<synchronous>, transform_indices = @transform_4, window_bounds = array<i64: 2, 3>}]} {
    %cst = arith.constant 0.000000e+00 : f32
    %0 = vector.broadcast %cst : f32 to vector<2x128xf32>
    %cst_0 = arith.constant 0.000000e+00 : f32
    %1 = vector.broadcast %cst_0 : f32 to vector<2x128xf32>
    %c0 = arith.constant 0 : index
    %c0_1 = arith.constant 0 : index
    %2 = vector.load %arg2[%c0, %c0_1] : memref<128x512xf32, #tpu.memory_space<vmem>>, vector<128x512xf32>
    %c0_2 = arith.constant 0 : index
    %c0_3 = arith.constant 0 : index
    %c0_4 = arith.constant 0 : index
    %3 = vector.load %arg1[%c0_2, %c0_3, %c0_4] : memref<8x2x512xf32, #tpu.memory_space<vmem>>, vector<1x2x512xf32>
    %4 = vector.shape_cast %3 : vector<1x2x512xf32> to vector<2x512xf32>
    %cst_5 = arith.constant dense<0.000000e+00> : vector<2x512xf32>
    %5 = tpu.matmul %0, %2, %cst_5 {dimension_numbers = #tpu.dot_dimension_numbers<[1], [0], [0], [1], [0, 0, 1, 1], [], []>} : vector<2x128xf32>, vector<128x512xf32>, vector<2x512xf32> -> vector<2x512xf32>
    %6 = arith.addf %4, %5 : vector<2x512xf32>
    %7 = vector.extract_strided_slice %6 {offsets = [0, 0], sizes = [2, 128], strides = [1, 1]} : vector<2x512xf32> to vector<2x128xf32>
    %8 = arith.negf %7 : vector<2x128xf32>
    %9 = math.exp %8 : vector<2x128xf32>
    %cst_6 = arith.constant 1.000000e+00 : f32
    %10 = vector.broadcast %cst_6 : f32 to vector<2x128xf32>
    %11 = arith.addf %10, %9 : vector<2x128xf32>
    %12 = arith.divf %10, %11 : vector<2x128xf32>
    %13 = vector.extract_strided_slice %6 {offsets = [0, 128], sizes = [2, 128], strides = [1, 1]} : vector<2x512xf32> to vector<2x128xf32>
    %14 = arith.negf %13 : vector<2x128xf32>
    %15 = math.exp %14 : vector<2x128xf32>
    %cst_7 = arith.constant 1.000000e+00 : f32
    %16 = vector.broadcast %cst_7 : f32 to vector<2x128xf32>
    %17 = arith.addf %16, %15 : vector<2x128xf32>
    %18 = arith.divf %16, %17 : vector<2x128xf32>
    %19 = vector.extract_strided_slice %6 {offsets = [0, 256], sizes = [2, 128], strides = [1, 1]} : vector<2x512xf32> to vector<2x128xf32>
    %20 = math.tanh %19 : vector<2x128xf32>
    %21 = vector.extract_strided_slice %6 {offsets = [0, 384], sizes = [2, 128], strides = [1, 1]} : vector<2x512xf32> to vector<2x128xf32>
    %22 = arith.negf %21 : vector<2x128xf32>
    %23 = math.exp %22 : vector<2x128xf32>
    %cst_8 = arith.constant 1.000000e+00 : f32
    %24 = vector.broadcast %cst_8 : f32 to vector<2x128xf32>
    %25 = arith.addf %24, %23 : vector<2x128xf32>
    %26 = arith.divf %24, %25 : vector<2x128xf32>
    %27 = arith.mulf %18, %1 : vector<2x128xf32>
    %28 = arith.mulf %12, %20 : vector<2x128xf32>
    %29 = arith.addf %27, %28 : vector<2x128xf32>
    %30 = math.tanh %29 : vector<2x128xf32>
    %31 = arith.mulf %26, %30 : vector<2x128xf32>
    %c1 = arith.constant 1 : index
    %c0_9 = arith.constant 0 : index
    %c0_10 = arith.constant 0 : index
    %32 = vector.load %arg1[%c1, %c0_9, %c0_10] : memref<8x2x512xf32, #tpu.memory_space<vmem>>, vector<1x2x512xf32>
    %33 = vector.shape_cast %32 : vector<1x2x512xf32> to vector<2x512xf32>
    %cst_11 = arith.constant dense<0.000000e+00> : vector<2x512xf32>
    %34 = tpu.matmul %31, %2, %cst_11 {dimension_numbers = #tpu.dot_dimension_numbers<[1], [0], [0], [1], [0, 0, 1, 1], [], []>} : vector<2x128xf32>, vector<128x512xf32>, vector<2x512xf32> -> vector<2x512xf32>
    %35 = arith.addf %33, %34 : vector<2x512xf32>
    %36 = vector.extract_strided_slice %35 {offsets = [0, 0], sizes = [2, 128], strides = [1, 1]} : vector<2x512xf32> to vector<2x128xf32>
    %37 = arith.negf %36 : vector<2x128xf32>
    %38 = math.exp %37 : vector<2x128xf32>
    %cst_12 = arith.constant 1.000000e+00 : f32
    %39 = vector.broadcast %cst_12 : f32 to vector<2x128xf32>
    %40 = arith.addf %39, %38 : vector<2x128xf32>
    %41 = arith.divf %39, %40 : vector<2x128xf32>
    %42 = vector.extract_strided_slice %35 {offsets = [0, 128], sizes = [2, 128], strides = [1, 1]} : vector<2x512xf32> to vector<2x128xf32>
    %43 = arith.negf %42 : vector<2x128xf32>
    %44 = math.exp %43 : vector<2x128xf32>
    %cst_13 = arith.constant 1.000000e+00 : f32
    %45 = vector.broadcast %cst_13 : f32 to vector<2x128xf32>
    %46 = arith.addf %45, %44 : vector<2x128xf32>
    %47 = arith.divf %45, %46 : vector<2x128xf32>
    %48 = vector.extract_strided_slice %35 {offsets = [0, 256], sizes = [2, 128], strides = [1, 1]} : vector<2x512xf32> to vector<2x128xf32>
    %49 = math.tanh %48 : vector<2x128xf32>
    %50 = vector.extract_strided_slice %35 {offsets = [0, 384], sizes = [2, 128], strides = [1, 1]} : vector<2x512xf32> to vector<2x128xf32>
    %51 = arith.negf %50 : vector<2x128xf32>
    %52 = math.exp %51 : vector<2x128xf32>
    %cst_14 = arith.constant 1.000000e+00 : f32
    %53 = vector.broadcast %cst_14 : f32 to vector<2x128xf32>
    %54 = arith.addf %53, %52 : vector<2x128xf32>
    %55 = arith.divf %53, %54 : vector<2x128xf32>
    %56 = arith.mulf %47, %29 : vector<2x128xf32>
    %57 = arith.mulf %41, %49 : vector<2x128xf32>
    %58 = arith.addf %56, %57 : vector<2x128xf32>
    %59 = math.tanh %58 : vector<2x128xf32>
    %60 = arith.mulf %55, %59 : vector<2x128xf32>
    %c2 = arith.constant 2 : index
    %c0_15 = arith.constant 0 : index
    %c0_16 = arith.constant 0 : index
    %61 = vector.load %arg1[%c2, %c0_15, %c0_16] : memref<8x2x512xf32, #tpu.memory_space<vmem>>, vector<1x2x512xf32>
    %62 = vector.shape_cast %61 : vector<1x2x512xf32> to vector<2x512xf32>
    %cst_17 = arith.constant dense<0.000000e+00> : vector<2x512xf32>
    %63 = tpu.matmul %60, %2, %cst_17 {dimension_numbers = #tpu.dot_dimension_numbers<[1], [0], [0], [1], [0, 0, 1, 1], [], []>} : vector<2x128xf32>, vector<128x512xf32>, vector<2x512xf32> -> vector<2x512xf32>
    %64 = arith.addf %62, %63 : vector<2x512xf32>
    %65 = vector.extract_strided_slice %64 {offsets = [0, 0], sizes = [2, 128], strides = [1, 1]} : vector<2x512xf32> to vector<2x128xf32>
    %66 = arith.negf %65 : vector<2x128xf32>
    %67 = math.exp %66 : vector<2x128xf32>
    %cst_18 = arith.constant 1.000000e+00 : f32
    %68 = vector.broadcast %cst_18 : f32 to vector<2x128xf32>
    %69 = arith.addf %68, %67 : vector<2x128xf32>
    %70 = arith.divf %68, %69 : vector<2x128xf32>
    %71 = vector.extract_strided_slice %64 {offsets = [0, 128], sizes = [2, 128], strides = [1, 1]} : vector<2x512xf32> to vector<2x128xf32>
    %72 = arith.negf %71 : vector<2x128xf32>
    %73 = math.exp %72 : vector<2x128xf32>
    %cst_19 = arith.constant 1.000000e+00 : f32
    %74 = vector.broadcast %cst_19 : f32 to vector<2x128xf32>
    %75 = arith.addf %74, %73 : vector<2x128xf32>
    %76 = arith.divf %74, %75 : vector<2x128xf32>
    %77 = vector.extract_strided_slice %64 {offsets = [0, 256], sizes = [2, 128], strides = [1, 1]} : vector<2x512xf32> to vector<2x128xf32>
    %78 = math.tanh %77 : vector<2x128xf32>
    %79 = vector.extract_strided_slice %64 {offsets = [0, 384], sizes = [2, 128], strides = [1, 1]} : vector<2x512xf32> to vector<2x128xf32>
    %80 = arith.negf %79 : vector<2x128xf32>
    %81 = math.exp %80 : vector<2x128xf32>
    %cst_20 = arith.constant 1.000000e+00 : f32
    %82 = vector.broadcast %cst_20 : f32 to vector<2x128xf32>
    %83 = arith.addf %82, %81 : vector<2x128xf32>
    %84 = arith.divf %82, %83 : vector<2x128xf32>
    %85 = arith.mulf %76, %58 : vector<2x128xf32>
    %86 = arith.mulf %70, %78 : vector<2x128xf32>
    %87 = arith.addf %85, %86 : vector<2x128xf32>
    %88 = math.tanh %87 : vector<2x128xf32>
    %89 = arith.mulf %84, %88 : vector<2x128xf32>
    %c3 = arith.constant 3 : index
    %c0_21 = arith.constant 0 : index
    %c0_22 = arith.constant 0 : index
    %90 = vector.load %arg1[%c3, %c0_21, %c0_22] : memref<8x2x512xf32, #tpu.memory_space<vmem>>, vector<1x2x512xf32>
    %91 = vector.shape_cast %90 : vector<1x2x512xf32> to vector<2x512xf32>
    %cst_23 = arith.constant dense<0.000000e+00> : vector<2x512xf32>
    %92 = tpu.matmul %89, %2, %cst_23 {dimension_numbers = #tpu.dot_dimension_numbers<[1], [0], [0], [1], [0, 0, 1, 1], [], []>} : vector<2x128xf32>, vector<128x512xf32>, vector<2x512xf32> -> vector<2x512xf32>
    %93 = arith.addf %91, %92 : vector<2x512xf32>
    %94 = vector.extract_strided_slice %93 {offsets = [0, 0], sizes = [2, 128], strides = [1, 1]} : vector<2x512xf32> to vector<2x128xf32>
    %95 = arith.negf %94 : vector<2x128xf32>
    %96 = math.exp %95 : vector<2x128xf32>
    %cst_24 = arith.constant 1.000000e+00 : f32
    %97 = vector.broadcast %cst_24 : f32 to vector<2x128xf32>
    %98 = arith.addf %97, %96 : vector<2x128xf32>
    %99 = arith.divf %97, %98 : vector<2x128xf32>
    %100 = vector.extract_strided_slice %93 {offsets = [0, 128], sizes = [2, 128], strides = [1, 1]} : vector<2x512xf32> to vector<2x128xf32>
    %101 = arith.negf %100 : vector<2x128xf32>
    %102 = math.exp %101 : vector<2x128xf32>
    %cst_25 = arith.constant 1.000000e+00 : f32
    %103 = vector.broadcast %cst_25 : f32 to vector<2x128xf32>
    %104 = arith.addf %103, %102 : vector<2x128xf32>
    %105 = arith.divf %103, %104 : vector<2x128xf32>
    %106 = vector.extract_strided_slice %93 {offsets = [0, 256], sizes = [2, 128], strides = [1, 1]} : vector<2x512xf32> to vector<2x128xf32>
    %107 = math.tanh %106 : vector<2x128xf32>
    %108 = vector.extract_strided_slice %93 {offsets = [0, 384], sizes = [2, 128], strides = [1, 1]} : vector<2x512xf32> to vector<2x128xf32>
    %109 = arith.negf %108 : vector<2x128xf32>
    %110 = math.exp %109 : vector<2x128xf32>
    %cst_26 = arith.constant 1.000000e+00 : f32
    %111 = vector.broadcast %cst_26 : f32 to vector<2x128xf32>
    %112 = arith.addf %111, %110 : vector<2x128xf32>
    %113 = arith.divf %111, %112 : vector<2x128xf32>
    %114 = arith.mulf %105, %87 : vector<2x128xf32>
    %115 = arith.mulf %99, %107 : vector<2x128xf32>
    %116 = arith.addf %114, %115 : vector<2x128xf32>
    %117 = math.tanh %116 : vector<2x128xf32>
    %118 = arith.mulf %113, %117 : vector<2x128xf32>
    %c4 = arith.constant 4 : index
    %c0_27 = arith.constant 0 : index
    %c0_28 = arith.constant 0 : index
    %119 = vector.load %arg1[%c4, %c0_27, %c0_28] : memref<8x2x512xf32, #tpu.memory_space<vmem>>, vector<1x2x512xf32>
    %120 = vector.shape_cast %119 : vector<1x2x512xf32> to vector<2x512xf32>
    %cst_29 = arith.constant dense<0.000000e+00> : vector<2x512xf32>
    %121 = tpu.matmul %118, %2, %cst_29 {dimension_numbers = #tpu.dot_dimension_numbers<[1], [0], [0], [1], [0, 0, 1, 1], [], []>} : vector<2x128xf32>, vector<128x512xf32>, vector<2x512xf32> -> vector<2x512xf32>
    %122 = arith.addf %120, %121 : vector<2x512xf32>
    %123 = vector.extract_strided_slice %122 {offsets = [0, 0], sizes = [2, 128], strides = [1, 1]} : vector<2x512xf32> to vector<2x128xf32>
    %124 = arith.negf %123 : vector<2x128xf32>
    %125 = math.exp %124 : vector<2x128xf32>
    %cst_30 = arith.constant 1.000000e+00 : f32
    %126 = vector.broadcast %cst_30 : f32 to vector<2x128xf32>
    %127 = arith.addf %126, %125 : vector<2x128xf32>
    %128 = arith.divf %126, %127 : vector<2x128xf32>
    %129 = vector.extract_strided_slice %122 {offsets = [0, 128], sizes = [2, 128], strides = [1, 1]} : vector<2x512xf32> to vector<2x128xf32>
    %130 = arith.negf %129 : vector<2x128xf32>
    %131 = math.exp %130 : vector<2x128xf32>
    %cst_31 = arith.constant 1.000000e+00 : f32
    %132 = vector.broadcast %cst_31 : f32 to vector<2x128xf32>
    %133 = arith.addf %132, %131 : vector<2x128xf32>
    %134 = arith.divf %132, %133 : vector<2x128xf32>
    %135 = vector.extract_strided_slice %122 {offsets = [0, 256], sizes = [2, 128], strides = [1, 1]} : vector<2x512xf32> to vector<2x128xf32>
    %136 = math.tanh %135 : vector<2x128xf32>
    %137 = vector.extract_strided_slice %122 {offsets = [0, 384], sizes = [2, 128], strides = [1, 1]} : vector<2x512xf32> to vector<2x128xf32>
    %138 = arith.negf %137 : vector<2x128xf32>
    %139 = math.exp %138 : vector<2x128xf32>
    %cst_32 = arith.constant 1.000000e+00 : f32
    %140 = vector.broadcast %cst_32 : f32 to vector<2x128xf32>
    %141 = arith.addf %140, %139 : vector<2x128xf32>
    %142 = arith.divf %140, %141 : vector<2x128xf32>
    %143 = arith.mulf %134, %116 : vector<2x128xf32>
    %144 = arith.mulf %128, %136 : vector<2x128xf32>
    %145 = arith.addf %143, %144 : vector<2x128xf32>
    %146 = math.tanh %145 : vector<2x128xf32>
    %147 = arith.mulf %142, %146 : vector<2x128xf32>
    %c5 = arith.constant 5 : index
    %c0_33 = arith.constant 0 : index
    %c0_34 = arith.constant 0 : index
    %148 = vector.load %arg1[%c5, %c0_33, %c0_34] : memref<8x2x512xf32, #tpu.memory_space<vmem>>, vector<1x2x512xf32>
    %149 = vector.shape_cast %148 : vector<1x2x512xf32> to vector<2x512xf32>
    %cst_35 = arith.constant dense<0.000000e+00> : vector<2x512xf32>
    %150 = tpu.matmul %147, %2, %cst_35 {dimension_numbers = #tpu.dot_dimension_numbers<[1], [0], [0], [1], [0, 0, 1, 1], [], []>} : vector<2x128xf32>, vector<128x512xf32>, vector<2x512xf32> -> vector<2x512xf32>
    %151 = arith.addf %149, %150 : vector<2x512xf32>
    %152 = vector.extract_strided_slice %151 {offsets = [0, 0], sizes = [2, 128], strides = [1, 1]} : vector<2x512xf32> to vector<2x128xf32>
    %153 = arith.negf %152 : vector<2x128xf32>
    %154 = math.exp %153 : vector<2x128xf32>
    %cst_36 = arith.constant 1.000000e+00 : f32
    %155 = vector.broadcast %cst_36 : f32 to vector<2x128xf32>
    %156 = arith.addf %155, %154 : vector<2x128xf32>
    %157 = arith.divf %155, %156 : vector<2x128xf32>
    %158 = vector.extract_strided_slice %151 {offsets = [0, 128], sizes = [2, 128], strides = [1, 1]} : vector<2x512xf32> to vector<2x128xf32>
    %159 = arith.negf %158 : vector<2x128xf32>
    %160 = math.exp %159 : vector<2x128xf32>
    %cst_37 = arith.constant 1.000000e+00 : f32
    %161 = vector.broadcast %cst_37 : f32 to vector<2x128xf32>
    %162 = arith.addf %161, %160 : vector<2x128xf32>
    %163 = arith.divf %161, %162 : vector<2x128xf32>
    %164 = vector.extract_strided_slice %151 {offsets = [0, 256], sizes = [2, 128], strides = [1, 1]} : vector<2x512xf32> to vector<2x128xf32>
    %165 = math.tanh %164 : vector<2x128xf32>
    %166 = vector.extract_strided_slice %151 {offsets = [0, 384], sizes = [2, 128], strides = [1, 1]} : vector<2x512xf32> to vector<2x128xf32>
    %167 = arith.negf %166 : vector<2x128xf32>
    %168 = math.exp %167 : vector<2x128xf32>
    %cst_38 = arith.constant 1.000000e+00 : f32
    %169 = vector.broadcast %cst_38 : f32 to vector<2x128xf32>
    %170 = arith.addf %169, %168 : vector<2x128xf32>
    %171 = arith.divf %169, %170 : vector<2x128xf32>
    %172 = arith.mulf %163, %145 : vector<2x128xf32>
    %173 = arith.mulf %157, %165 : vector<2x128xf32>
    %174 = arith.addf %172, %173 : vector<2x128xf32>
    %175 = math.tanh %174 : vector<2x128xf32>
    %176 = arith.mulf %171, %175 : vector<2x128xf32>
    %c6 = arith.constant 6 : index
    %c0_39 = arith.constant 0 : index
    %c0_40 = arith.constant 0 : index
    %177 = vector.load %arg1[%c6, %c0_39, %c0_40] : memref<8x2x512xf32, #tpu.memory_space<vmem>>, vector<1x2x512xf32>
    %178 = vector.shape_cast %177 : vector<1x2x512xf32> to vector<2x512xf32>
    %cst_41 = arith.constant dense<0.000000e+00> : vector<2x512xf32>
    %179 = tpu.matmul %176, %2, %cst_41 {dimension_numbers = #tpu.dot_dimension_numbers<[1], [0], [0], [1], [0, 0, 1, 1], [], []>} : vector<2x128xf32>, vector<128x512xf32>, vector<2x512xf32> -> vector<2x512xf32>
    %180 = arith.addf %178, %179 : vector<2x512xf32>
    %181 = vector.extract_strided_slice %180 {offsets = [0, 0], sizes = [2, 128], strides = [1, 1]} : vector<2x512xf32> to vector<2x128xf32>
    %182 = arith.negf %181 : vector<2x128xf32>
    %183 = math.exp %182 : vector<2x128xf32>
    %cst_42 = arith.constant 1.000000e+00 : f32
    %184 = vector.broadcast %cst_42 : f32 to vector<2x128xf32>
    %185 = arith.addf %184, %183 : vector<2x128xf32>
    %186 = arith.divf %184, %185 : vector<2x128xf32>
    %187 = vector.extract_strided_slice %180 {offsets = [0, 128], sizes = [2, 128], strides = [1, 1]} : vector<2x512xf32> to vector<2x128xf32>
    %188 = arith.negf %187 : vector<2x128xf32>
    %189 = math.exp %188 : vector<2x128xf32>
    %cst_43 = arith.constant 1.000000e+00 : f32
    %190 = vector.broadcast %cst_43 : f32 to vector<2x128xf32>
    %191 = arith.addf %190, %189 : vector<2x128xf32>
    %192 = arith.divf %190, %191 : vector<2x128xf32>
    %193 = vector.extract_strided_slice %180 {offsets = [0, 256], sizes = [2, 128], strides = [1, 1]} : vector<2x512xf32> to vector<2x128xf32>
    %194 = math.tanh %193 : vector<2x128xf32>
    %195 = vector.extract_strided_slice %180 {offsets = [0, 384], sizes = [2, 128], strides = [1, 1]} : vector<2x512xf32> to vector<2x128xf32>
    %196 = arith.negf %195 : vector<2x128xf32>
    %197 = math.exp %196 : vector<2x128xf32>
    %cst_44 = arith.constant 1.000000e+00 : f32
    %198 = vector.broadcast %cst_44 : f32 to vector<2x128xf32>
    %199 = arith.addf %198, %197 : vector<2x128xf32>
    %200 = arith.divf %198, %199 : vector<2x128xf32>
    %201 = arith.mulf %192, %174 : vector<2x128xf32>
    %202 = arith.mulf %186, %194 : vector<2x128xf32>
    %203 = arith.addf %201, %202 : vector<2x128xf32>
    %204 = math.tanh %203 : vector<2x128xf32>
    %205 = arith.mulf %200, %204 : vector<2x128xf32>
    %c7 = arith.constant 7 : index
    %c0_45 = arith.constant 0 : index
    %c0_46 = arith.constant 0 : index
    %206 = vector.load %arg1[%c7, %c0_45, %c0_46] : memref<8x2x512xf32, #tpu.memory_space<vmem>>, vector<1x2x512xf32>
    %207 = vector.shape_cast %206 : vector<1x2x512xf32> to vector<2x512xf32>
    %cst_47 = arith.constant dense<0.000000e+00> : vector<2x512xf32>
    %208 = tpu.matmul %205, %2, %cst_47 {dimension_numbers = #tpu.dot_dimension_numbers<[1], [0], [0], [1], [0, 0, 1, 1], [], []>} : vector<2x128xf32>, vector<128x512xf32>, vector<2x512xf32> -> vector<2x512xf32>
    %209 = arith.addf %207, %208 : vector<2x512xf32>
    %210 = vector.extract_strided_slice %209 {offsets = [0, 0], sizes = [2, 128], strides = [1, 1]} : vector<2x512xf32> to vector<2x128xf32>
    %211 = arith.negf %210 : vector<2x128xf32>
    %212 = math.exp %211 : vector<2x128xf32>
    %cst_48 = arith.constant 1.000000e+00 : f32
    %213 = vector.broadcast %cst_48 : f32 to vector<2x128xf32>
    %214 = arith.addf %213, %212 : vector<2x128xf32>
    %215 = arith.divf %213, %214 : vector<2x128xf32>
    %216 = vector.extract_strided_slice %209 {offsets = [0, 128], sizes = [2, 128], strides = [1, 1]} : vector<2x512xf32> to vector<2x128xf32>
    %217 = arith.negf %216 : vector<2x128xf32>
    %218 = math.exp %217 : vector<2x128xf32>
    %cst_49 = arith.constant 1.000000e+00 : f32
    %219 = vector.broadcast %cst_49 : f32 to vector<2x128xf32>
    %220 = arith.addf %219, %218 : vector<2x128xf32>
    %221 = arith.divf %219, %220 : vector<2x128xf32>
    %222 = vector.extract_strided_slice %209 {offsets = [0, 256], sizes = [2, 128], strides = [1, 1]} : vector<2x512xf32> to vector<2x128xf32>
    %223 = math.tanh %222 : vector<2x128xf32>
    %224 = vector.extract_strided_slice %209 {offsets = [0, 384], sizes = [2, 128], strides = [1, 1]} : vector<2x512xf32> to vector<2x128xf32>
    %225 = arith.negf %224 : vector<2x128xf32>
    %226 = math.exp %225 : vector<2x128xf32>
    %cst_50 = arith.constant 1.000000e+00 : f32
    %227 = vector.broadcast %cst_50 : f32 to vector<2x128xf32>
    %228 = arith.addf %227, %226 : vector<2x128xf32>
    %229 = arith.divf %227, %228 : vector<2x128xf32>
    %230 = arith.mulf %221, %203 : vector<2x128xf32>
    %231 = arith.mulf %215, %223 : vector<2x128xf32>
    %232 = arith.addf %230, %231 : vector<2x128xf32>
    %233 = math.tanh %232 : vector<2x128xf32>
    %234 = arith.mulf %229, %233 : vector<2x128xf32>
    %c0_51 = arith.constant 0 : index
    %c0_52 = arith.constant 0 : index
    %235 = vector.load %arg3[%c0_51, %c0_52] : memref<128x3xf32, #tpu.memory_space<vmem>>, vector<128x3xf32>
    %cst_53 = arith.constant dense<0.000000e+00> : vector<2x3xf32>
    %236 = tpu.matmul %234, %235, %cst_53 {dimension_numbers = #tpu.dot_dimension_numbers<[1], [0], [0], [1], [0, 0, 1, 1], [], []>} : vector<2x128xf32>, vector<128x3xf32>, vector<2x3xf32> -> vector<2x3xf32>
    %c0_54 = arith.constant 0 : index
    %c0_55 = arith.constant 0 : index
    %237 = vector.load %arg4[%c0_54, %c0_55] : memref<1x3xf32, #tpu.memory_space<vmem>>, vector<1x3xf32>
    %238 = vector.broadcast %237 : vector<1x3xf32> to vector<2x3xf32>
    %239 = arith.addf %236, %238 : vector<2x3xf32>
    %c0_56 = arith.constant 0 : index
    %c0_57 = arith.constant 0 : index
    %240 = vector.load %arg5[%c0_56, %c0_57] : memref<2x3xf32, #tpu.memory_space<vmem>>, vector<2x3xf32>
    tpu.vector_store %arg5[%c0_56, %c0_57], %239 {strides = array<i32>} : memref<2x3xf32, #tpu.memory_space<vmem>>, vector<2x3xf32>,
    return
  }
  func.func @transform_0(%arg0: i32) -> (i32, i32, i32) {
    %c0_i32 = arith.constant 0 : i32
    %c0_i32_0 = arith.constant 0 : i32
    %c0_i32_1 = arith.constant 0 : i32
    %c0_i32_2 = arith.constant 0 : i32
    return %c0_i32, %c0_i32_0, %c0_i32_1 : i32, i32, i32
  }
  func.func @transform_1(%arg0: i32) -> (i32, i32) {
    %c0_i32 = arith.constant 0 : i32
    %c0_i32_0 = arith.constant 0 : i32
    %c0_i32_1 = arith.constant 0 : i32
    return %c0_i32, %c0_i32_0 : i32, i32
  }
  func.func @transform_2(%arg0: i32) -> (i32, i32) {
    %c0_i32 = arith.constant 0 : i32
    %c0_i32_0 = arith.constant 0 : i32
    %c0_i32_1 = arith.constant 0 : i32
    return %c0_i32, %c0_i32_0 : i32, i32
  }
  func.func @transform_3(%arg0: i32) -> (i32, i32) {
    %c0_i32 = arith.constant 0 : i32
    %c0_i32_0 = arith.constant 0 : i32
    %c0_i32_1 = arith.constant 0 : i32
    return %c0_i32, %c0_i32_0 : i32, i32
  }
  func.func @transform_4(%arg0: i32) -> (i32, i32) {
    %c0_i32 = arith.constant 0 : i32
    %c0_i32_0 = arith.constant 0 : i32
    %c0_i32_1 = arith.constant 0 : i32
    return %c0_i32, %c0_i32_0 : i32, i32
  }
}

</mosaic_0001>

<bundles_post_ra>
// kernel: rnn_forward.1
= control target key start
LH: loop header
LB: loop body
LE: loop exit
PB: predicated region body
PF: predicated region fallthrough
CT: control target
= control target key end

     0   :  { %9 = vsyncpa [#allocation3], 0  ;;  %s3078_s0 = inlined_call_operand.vmem [shape: f32[8,2,512], index: 0, kind: input, shape index: {}]   ;;  %s3079_s1 = inlined_call_operand.hbm [shape: f32[128,512], index: 1, kind: input, shape index: {}]   ;;  %s3080_s2 = inlined_call_operand.vmem [shape: f32[128,3], index: 2, kind: input, shape index: {}]   ;;  %s3081_s3 = inlined_call_operand.vmem [shape: f32[1,3], index: 3, kind: input, shape index: {}]   ;;  %s3082_s4 = inlined_call_operand.hbm [shape: f32[2,3], index: 4, kind: output, shape index: {}]  }
   0x1   :  { %10 = vsyncpa [#allocation4], 0  ;;  %s2116_s15 = smov [#allocation2]  }
   0x2   :  { %s18_s16 = sshll.u32 %s2116_s15, 4  ;;  %s19_s16 = int_to_ptr.vmem [resolvable:$true] %s18_s16 }
   0x3   :  { %s2080_s17 = scalar_lea.vmem %s19_s16, 8192  ;;  %p2085_p1 = scmp.lt.s32.totalorder %s19_s16, %s19_s16 }
   0x4   :  { %p2081_p0 = scmp.ne.s32.totalorder %s19_s16, %s2080_s17  ;;  %p2086_p2 = scmp.lt.s32.totalorder %s2080_s17, %s2080_s17 }
   0x6   :  { %p2087_p3 = por %p2086_p2, %p2085_p1 }
   0x8   :  { %p2088_p4 = pnand %p2087_p3, %p2081_p0 }
   0xa   :  { %2091 = shalt.err (!%p2088_p4)
}
   0xb   :  { %s2117_s18 = smov 512   ;;  %s2118_s19 = smov 32  }
   0xc   :  { %24 = dma.hbm_to_vmem [thread:$0]  %s3079_s1, 8192, %s19_s16, [#allocation3], %s2117_s18, %s2117_s18, %s2118_s19  }
   0xd   :  { %2112 = dma.done.wait [#allocation3], 8192  }
   0xe   :  { %2113 = vsyncadd [#allocation3], 4294959104  ;;  %v3083_v0 = vmov 0.0   ;;  %v2153_v1 = vld [vmem:[#allocation2 + $0x1e8] sm:$0xff]  ;;  %v2155_v2 = vld [vmem:[#allocation2 + $0x1f8] sm:$0xff]  ;;  %vm2121_vm0 = vmmov 0  }
   0xf   :  { %161 = vmatprep.mubr.f32.mxu0 %v3083_v0  ;;  %232 = vmatprep.mubr.f32.mxu1 %v3083_v0  ;;  %3164 = vst [vmem:[#allocation8_spill] sm:$0xff] %v2153_v1  ;;  %3165 = vst [vmem:[#allocation9_spill] sm:$0xff] %v2155_v2  ;;  %v2157_v3 = vld [vmem:[#allocation2 + $0x1e0] sm:$0xff]  ;;  %v2161_v4 = vld [vmem:[#allocation2 + $0x1f0] sm:$0xff]  ;;  %s2122_s16 = smov [#allocation5]   ;;  %vm1772_vm1 = vcmask 17408  }
  0x10   :  { %97 = vmatprep.subr.mxu0 %v2153_v1  ;;  %168 = vmatprep.subr.mxu1 %v2155_v2  ;;  %v2163_v5 = vld [vmem:[#allocation2 + $0x1c8] sm:$0xff]  ;;  %v2165_v6 = vld [vmem:[#allocation2 + $0x1d8] sm:$0xff]  ;;  %v2169_v7 = vld [vmem:[#allocation2 + $0x1c0] sm:$0xff]  ;;  %s1780_s17 = sshll.u32 %s2122_s16, 4  ;;  %s1781_s17 = int_to_ptr.vmem [resolvable:$true] %s1780_s17 }
  0x11   :  { %98 = vmatpush1.msra.mxu0 %v2157_v3  ;;  %169 = vmatpush1.msra.mxu1 %v2161_v4  ;;  %v2171_v8 = vld [vmem:[#allocation2 + $0x1d0] sm:$0xff]  ;;  %v2173_v9 = vld [vmem:[#allocation2 + $0x1a8] sm:$0xff]  ;;  %v2177_v10 = vld [vmem:[#allocation2 + $0x1b8] sm:$0xff]  ;;  %s2092_s18 = scalar_lea.vmem %s1781_s17, 32  ;;  %p2097_p6 = scmp.lt.s32.totalorder %s1781_s17, %s1781_s17 }
  0x12   :  { %99 = vmatprep.subr.mxu0 %v2163_v5  ;;  %170 = vmatprep.subr.mxu1 %v2165_v6  ;;  %v2179_v11 = vld [vmem:[#allocation2 + $0x1a0] sm:$0xff]  ;;  %v2181_v12 = vld [vmem:[#allocation2 + $0x1b0] sm:$0xff]  ;;  %v2185_v13 = vld [vmem:[#allocation2 + $0x188] sm:$0xff]  ;;  %p2093_p5 = scmp.ne.s32.totalorder %s1781_s17, %s2092_s18  ;;  %p2098_p7 = scmp.lt.s32.totalorder %s2092_s18, %s2092_s18 }
  0x13   :  { %100 = vmatpush1.msra.mxu0 %v2169_v7  ;;  %171 = vmatpush1.msra.mxu1 %v2171_v8  ;;  %v2187_v14 = vld [vmem:[#allocation2 + $0x198] sm:$0xff]  ;;  %v2191_v15 = vld [vmem:[#allocation2 + $0x180] sm:$0xff]  ;;  %v2193_v16 = vld [vmem:[#allocation2 + $0x190] sm:$0xff] }
  0x14   :  { %101 = vmatprep.subr.mxu0 %v2173_v9  ;;  %172 = vmatprep.subr.mxu1 %v2177_v10  ;;  %v2197_v17 = vld [vmem:[#allocation2 + $0x168] sm:$0xff]  ;;  %v2199_v18 = vld [vmem:[#allocation2 + $0x178] sm:$0xff]  ;;  %v2203_v19 = vld [vmem:[#allocation2 + $0x160] sm:$0xff]  ;;  %p2099_p8 = por %p2098_p7, %p2097_p6 }
  0x15   :  { %102 = vmatpush1.msra.mxu0 %v2179_v11  ;;  %173 = vmatpush1.msra.mxu1 %v2181_v12  ;;  %v2205_v20 = vld [vmem:[#allocation2 + $0x170] sm:$0xff]  ;;  %v2209_v21 = vld [vmem:[#allocation2 + $0x148] sm:$0xff]  ;;  %v2211_v22 = vld [vmem:[#allocation2 + $0x158] sm:$0xff] }
  0x16   :  { %103 = vmatprep.subr.mxu0 %v2185_v13  ;;  %174 = vmatprep.subr.mxu1 %v2187_v14  ;;  %v2215_v23 = vld [vmem:[#allocation2 + $0x140] sm:$0xff]  ;;  %v2217_v24 = vld [vmem:[#allocation2 + $0x150] sm:$0xff]  ;;  %v2221_v25 = vld [vmem:[#allocation2 + $0x128] sm:$0xff]  ;;  %p2100_p9 = pnand %p2099_p8, %p2093_p5 }
  0x17   :  { %104 = vmatpush1.msra.mxu0 %v2191_v15  ;;  %175 = vmatpush1.msra.mxu1 %v2193_v16  ;;  %v2223_v26 = vld [vmem:[#allocation2 + $0x138] sm:$0xff]  ;;  %v2227_v27 = vld [vmem:[#allocation2 + $0x120] sm:$0xff]  ;;  %v2229_v28 = vld [vmem:[#allocation2 + $0x130] sm:$0xff] }
  0x18   :  { %105 = vmatprep.subr.mxu0 %v2197_v17  ;;  %176 = vmatprep.subr.mxu1 %v2199_v18  ;;  %v2233_v29 = vld [vmem:[#allocation2 + $0x108] sm:$0xff]  ;;  %v2235_v30 = vld [vmem:[#allocation2 + $0x118] sm:$0xff]  ;;  %v2239_v31 = vld [vmem:[#allocation2 + $0x100] sm:$0xff] }
  0x19   :  { %106 = vmatpush1.msra.mxu0 %v2203_v19  ;;  %177 = vmatpush1.msra.mxu1 %v2205_v20  ;;  %v2241_v32 = vld [vmem:[#allocation2 + $0x110] sm:$0xff]  ;;  %v2245_v33 = vld [vmem:[#allocation2 + $0xe8] sm:$0xff]  ;;  %v2247_v34 = vld [vmem:[#allocation2 + $0xf8] sm:$0xff] }
  0x1a   :  { %107 = vmatprep.subr.mxu0 %v2209_v21  ;;  %178 = vmatprep.subr.mxu1 %v2211_v22  ;;  %v2251_v35 = vld [vmem:[#allocation2 + $0xe0] sm:$0xff]  ;;  %v2253_v36 = vld [vmem:[#allocation2 + $0xf0] sm:$0xff]  ;;  %v2257_v37 = vld [vmem:[#allocation2 + $0xc8] sm:$0xff] }
  0x1b   :  { %108 = vmatpush1.msra.mxu0 %v2215_v23  ;;  %179 = vmatpush1.msra.mxu1 %v2217_v24  ;;  %v2259_v38 = vld [vmem:[#allocation2 + $0xd8] sm:$0xff]  ;;  %v2263_v39 = vld [vmem:[#allocation2 + $0xc0] sm:$0xff]  ;;  %v2265_v40 = vld [vmem:[#allocation2 + $0xd0] sm:$0xff] }
  0x1c   :  { %109 = vmatprep.subr.mxu0 %v2221_v25  ;;  %180 = vmatprep.subr.mxu1 %v2223_v26  ;;  %v2269_v41 = vld [vmem:[#allocation2 + $0xa8] sm:$0xff]  ;;  %v2271_v42 = vld [vmem:[#allocation2 + $0xb8] sm:$0xff]  ;;  %v2275_v43 = vld [vmem:[#allocation2 + $0xa0] sm:$0xff] }
  0x1d   :  { %110 = vmatpush1.msra.mxu0 %v2227_v27  ;;  %181 = vmatpush1.msra.mxu1 %v2229_v28  ;;  %v2277_v44 = vld [vmem:[#allocation2 + $0xb0] sm:$0xff]  ;;  %v2281_v45 = vld [vmem:[#allocation2 + $0x88] sm:$0xff]  ;;  %v2283_v46 = vld [vmem:[#allocation2 + $0x98] sm:$0xff] }
  0x1e   :  { %111 = vmatprep.subr.mxu0 %v2233_v29  ;;  %182 = vmatprep.subr.mxu1 %v2235_v30  ;;  %3166 = vst [vmem:[#allocation10_spill] sm:$0xff] %v2281_v45  ;;  %v2287_v47 = vld [vmem:[#allocation2 + $0x80] sm:$0xff]  ;;  %v2289_v48 = vld [vmem:[#allocation2 + $0x90] sm:$0xff]  ;;  %v2293_v49 = vld [vmem:[#allocation2 + $0x68] sm:$0xff] }
  0x1f   :  { %112 = vmatpush1.msra.mxu0 %v2239_v31  ;;  %183 = vmatpush1.msra.mxu1 %v2241_v32  ;;  %3167 = vst [vmem:[#allocation11_spill] sm:$0xff] %v2289_v48  ;;  %3168 = vst [vmem:[#allocation12_spill] sm:$0xff] %v2293_v49  ;;  %v2295_v50 = vld [vmem:[#allocation2 + $0x78] sm:$0xff]  ;;  %v2299_v51 = vld [vmem:[#allocation2 + $0x60] sm:$0xff] }
  0x20   :  { %113 = vmatprep.subr.mxu0 %v2245_v33  ;;  %184 = vmatprep.subr.mxu1 %v2247_v34  ;;  %3169 = vst [vmem:[#allocation13_spill] sm:$0xff] %v2295_v50  ;;  %3170 = vst [vmem:[#allocation14_spill] sm:$0xff] %v2299_v51  ;;  %v2301_v52 = vld [vmem:[#allocation2 + $0x70] sm:$0xff]  ;;  %v2305_v53 = vld [vmem:[#allocation2 + $0x48] sm:$0xff] }
  0x21   :  { %114 = vmatpush1.msra.mxu0 %v2251_v35  ;;  %185 = vmatpush1.msra.mxu1 %v2253_v36  ;;  %3171 = vst [vmem:[#allocation15_spill] sm:$0xff] %v2301_v52  ;;  %3172 = vst [vmem:[#allocation16_spill] sm:$0xff] %v2305_v53  ;;  %v2307_v54 = vld [vmem:[#allocation2 + $0x58] sm:$0xff]  ;;  %v2311_v55 = vld [vmem:[#allocation2 + $0x40] sm:$0xff] }
  0x22   :  { %115 = vmatprep.subr.mxu0 %v2257_v37  ;;  %186 = vmatprep.subr.mxu1 %v2259_v38  ;;  %3173 = vst [vmem:[#allocation17_spill] sm:$0xff] %v2307_v54  ;;  %3174 = vst [vmem:[#allocation18_spill] sm:$0xff] %v2311_v55  ;;  %v2313_v56 = vld [vmem:[#allocation2 + $0x50] sm:$0xff]  ;;  %v2317_v57 = vld [vmem:[#allocation2 + $0x28] sm:$0xff] }
  0x23   :  { %116 = vmatpush1.msra.mxu0 %v2263_v39  ;;  %187 = vmatpush1.msra.mxu1 %v2265_v40  ;;  %3175 = vst [vmem:[#allocation19_spill] sm:$0xff] %v2313_v56  ;;  %3176 = vst [vmem:[#allocation20_spill] sm:$0xff] %v2317_v57  ;;  %v2319_v58 = vld [vmem:[#allocation2 + $0x38] sm:$0xff]  ;;  %v2323_v59 = vld [vmem:[#allocation2 + $0x20] sm:$0xff] }
  0x24   :  { %117 = vmatprep.subr.mxu0 %v2269_v41  ;;  %188 = vmatprep.subr.mxu1 %v2271_v42  ;;  %3177 = vst [vmem:[#allocation21_spill] sm:$0xff] %v2319_v58  ;;  %3178 = vst [vmem:[#allocation22_spill] sm:$0xff] %v2323_v59  ;;  %v2325_v60 = vld [vmem:[#allocation2 + $0x30] sm:$0xff]  ;;  %v2329_v61 = vld [vmem:[#allocation2 + $0x8] sm:$0xff] }
  0x25   :  { %118 = vmatpush1.msra.mxu0 %v2275_v43  ;;  %189 = vmatpush1.msra.mxu1 %v2277_v44  ;;  %3179 = vst [vmem:[#allocation23_spill] sm:$0xff] %v2325_v60  ;;  %3180 = vst [vmem:[#allocation24_spill] sm:$0xff] %v2329_v61  ;;  %v2331_v62 = vld [vmem:[#allocation2 + $0x18] sm:$0xff]  ;;  %v2335_v63 = vld [vmem:[#allocation2] sm:$0xff] }
  0x26   :  { %119 = vmatprep.subr.mxu0 %v2281_v45  ;;  %190 = vmatprep.subr.mxu1 %v2283_v46  ;;  %3181 = vst [vmem:[#allocation25_spill] sm:$0xff] %v2331_v62  ;;  %3182 = vst [vmem:[#allocation26_spill] sm:$0xff] %v2335_v63  ;;  %v2337_v0 = vld [vmem:[#allocation2 + $0x10] sm:$0xff] }
  0x27   :  { %120 = vmatpush1.msra.mxu0 %v2287_v47  ;;  %191 = vmatpush1.msra.mxu1 %v2289_v48  ;;  %3183 = vst [vmem:[#allocation27_spill] sm:$0xff] %v2337_v0 }
  0x28   :  { %121 = vmatprep.subr.mxu0 %v2293_v49  ;;  %192 = vmatprep.subr.mxu1 %v2295_v50 }
  0x29   :  { %122 = vmatpush1.msra.mxu0 %v2299_v51  ;;  %193 = vmatpush1.msra.mxu1 %v2301_v52 }
  0x2a   :  { %123 = vmatprep.subr.mxu0 %v2305_v53  ;;  %194 = vmatprep.subr.mxu1 %v2307_v54 }
  0x2b   :  { %124 = vmatpush1.msra.mxu0 %v2311_v55  ;;  %195 = vmatpush1.msra.mxu1 %v2313_v56  ;;  %v3184_v56 = vmov 0.0  }
  0x2c   :  { %125 = vmatprep.subr.mxu0 %v2317_v57  ;;  %196 = vmatprep.subr.mxu1 %v2319_v58 }
  0x2d   :  { %126 = vmatpush1.msra.mxu0 %v2323_v59  ;;  %197 = vmatpush1.msra.mxu1 %v2325_v60 }
  0x2e   :  { %127 = vmatprep.subr.mxu0 %v2329_v61  ;;  %198 = vmatprep.subr.mxu1 %v2331_v62 }
  0x2f   :  { %128 = vmatpush1.msra.mxu0 %v2335_v63  ;;  %199 = vmatpush1.msra.mxu1 %v2337_v0 }
  0x30   :  { %162 = vmatmul.mubr.f32.vlgmr.msra.gmra.mxu0 %v3184_v56  ;;  %233 = vmatmul.mubr.f32.vlgmr.msra.gmra.mxu1 %v3184_v56 }
  0x31   :  { %295 = vmatprep.subr.mxu0 %v2153_v1  ;;  %366 = vmatprep.subr.mxu1 %v2155_v2 }
  0x32   :  { %296 = vmatpush1.msra.mxu0 %v2157_v3  ;;  %367 = vmatpush1.msra.mxu1 %v2161_v4 }
  0x33   :  { %297 = vmatprep.subr.mxu0 %v2163_v5  ;;  %368 = vmatprep.subr.mxu1 %v2165_v6 }
  0x34   :  { %298 = vmatpush1.msra.mxu0 %v2169_v7  ;;  %369 = vmatpush1.msra.mxu1 %v2171_v8 }
  0x35   :  { %299 = vmatprep.subr.mxu0 %v2173_v9  ;;  %370 = vmatprep.subr.mxu1 %v2177_v10 }
  0x36   :  { %300 = vmatpush1.msra.mxu0 %v2179_v11  ;;  %371 = vmatpush1.msra.mxu1 %v2181_v12 }
  0x37   :  { %301 = vmatprep.subr.mxu0 %v2185_v13  ;;  %372 = vmatprep.subr.mxu1 %v2187_v14 }
  0x38   :  { %302 = vmatpush1.msra.mxu0 %v2191_v15  ;;  %373 = vmatpush1.msra.mxu1 %v2193_v16 }
  0x39   :  { %303 = vmatprep.subr.mxu0 %v2197_v17  ;;  %374 = vmatprep.subr.mxu1 %v2199_v18 }
  0x3a   :  { %304 = vmatpush1.msra.mxu0 %v2203_v19  ;;  %375 = vmatpush1.msra.mxu1 %v2205_v20 }
  0x3b   :  { %305 = vmatprep.subr.mxu0 %v2209_v21  ;;  %376 = vmatprep.subr.mxu1 %v2211_v22 }
  0x3c   :  { %306 = vmatpush1.msra.mxu0 %v2215_v23  ;;  %377 = vmatpush1.msra.mxu1 %v2217_v24 }
  0x3d   :  { %307 = vmatprep.subr.mxu0 %v2221_v25  ;;  %378 = vmatprep.subr.mxu1 %v2223_v26 }
  0x3e   :  { %308 = vmatpush1.msra.mxu0 %v2227_v27  ;;  %379 = vmatpush1.msra.mxu1 %v2229_v28 }
  0x3f   :  { %309 = vmatprep.subr.mxu0 %v2233_v29  ;;  %380 = vmatprep.subr.mxu1 %v2235_v30 }
  0x40   :  { %310 = vmatpush1.msra.mxu0 %v2239_v31  ;;  %381 = vmatpush1.msra.mxu1 %v2241_v32 }
  0x41   :  { %311 = vmatprep.subr.mxu0 %v2245_v33  ;;  %382 = vmatprep.subr.mxu1 %v2247_v34 }
  0x42   :  { %312 = vmatpush1.msra.mxu0 %v2251_v35  ;;  %383 = vmatpush1.msra.mxu1 %v2253_v36 }
  0x43   :  { %313 = vmatprep.subr.mxu0 %v2257_v37  ;;  %384 = vmatprep.subr.mxu1 %v2259_v38 }
  0x44   :  { %314 = vmatpush1.msra.mxu0 %v2263_v39  ;;  %385 = vmatpush1.msra.mxu1 %v2265_v40 }
  0x45   :  { %315 = vmatprep.subr.mxu0 %v2269_v41  ;;  %386 = vmatprep.subr.mxu1 %v2271_v42 }
  0x46   :  { %316 = vmatpush1.msra.mxu0 %v2275_v43  ;;  %387 = vmatpush1.msra.mxu1 %v2277_v44 }
  0x47   :  { %317 = vmatprep.subr.mxu0 %v2281_v45  ;;  %388 = vmatprep.subr.mxu1 %v2283_v46  ;;  %v3185_v45 = vld [vmem:[#allocation19_spill] sm:$0xff] }
  0x48   :  { %318 = vmatpush1.msra.mxu0 %v2287_v47  ;;  %389 = vmatpush1.msra.mxu1 %v2289_v48 }
  0x49   :  { %319 = vmatprep.subr.mxu0 %v2293_v49  ;;  %390 = vmatprep.subr.mxu1 %v2295_v50 }
  0x4a   :  { %320 = vmatpush1.msra.mxu0 %v2299_v51  ;;  %391 = vmatpush1.msra.mxu1 %v2301_v52 }
  0x4b   :  { %321 = vmatprep.subr.mxu0 %v2305_v53  ;;  %392 = vmatprep.subr.mxu1 %v2307_v54 }
  0x4c   :  { %322 = vmatpush1.msra.mxu0 %v2311_v55  ;;  %393 = vmatpush1.msra.mxu1 %v3185_v45 }
  0x4d   :  { %323 = vmatprep.subr.mxu0 %v2317_v57  ;;  %394 = vmatprep.subr.mxu1 %v2319_v58  ;;  %v2120_v58 = vmov 1983009808   ;;  %v248_v57 = vlaneseq }
  0x4e   :  { %324 = vmatpush1.msra.mxu0 %v2323_v59  ;;  %395 = vmatpush1.msra.mxu1 %v2325_v60  ;;  %v246_v59 = vunpack.c.l.s4 %v2120_v58 }
  0x4f   :  { %325 = vmatprep.subr.mxu0 %v2329_v61  ;;  %396 = vmatprep.subr.mxu1 %v2331_v62  ;;  %v249_v45 = vshrl.u32 %v248_v57, 7 }
  0x50   :  { %326 = vmatpush1.msra.mxu0 %v2335_v63  ;;  %359 = vmatprep.mubr.f32.mxu0 %v3184_v56  ;;  %v247_v60 = vunpack.c.0.s8 %v246_v59 }
  0x51   :  { %397 = vmatpush1.msra.mxu1 %v2337_v0  ;;  %430 = vmatprep.mubr.f32.mxu1 %v3184_v56 }
  0x52   :  { %493 = vmatprep.subr.mxu0 %v2153_v1  ;;  %564 = vmatprep.subr.mxu1 %v2155_v2  ;;  %v2415_v62 = vsub.s32 %v247_v60, %v249_v45  ;;  %v96_v2 = vld [vmem:[%s3078_s0] sm:$0xff] }
  0xf0   :  { %v163_v61 = vpop.f32.mrf.mxu0  ;;  %v234_v55 = vpop.f32.mrf.mxu1 }
  0xf2   :  { %v165_v63 = vpop.f32.mrf.mxu0  ;;  %v236_v54 = vpop.f32.mrf.mxu1 }
  0xf3   :  { %v243_v53 = vcombine.low %v163_v61, %v165_v63  ;;  %v244_v52 = vcombine.low %v234_v55, %v236_v54 }
  0xf5   :  { %v251_v0 = vrot.slane %v243_v53, %v2415_v62  ;;  %v258_v56 = vrot.slane %v244_v52, %v2415_v62 }
  0xf7   :  { %v259_v58 = vcombine.low %v251_v0, %v258_v56 }
  0xf9   :  { %v261_v1 = vadd.f32 %v259_v58, %v96_v2 }
  0xfb   :  { %v1789_v59 = vmul.f32 -1.442695, %v261_v1  ;;  %v269_v57 = vrot.slane %v261_v1, 2  ;;  %v280_v45 = vrot.slane %v261_v1, 6  ;;  %v277_v61 = vrot.slane %v261_v1, 4 }
  0xfd   :  { %1880 = vpow2.f32 %v1789_v59  ;;  %v1790_v51 = vmul.f32 -1.442695, %v269_v57  ;;  %v1791_v60 = vmul.f32 -1.442695, %v280_v45  ;;  %v3186_v45 = vld [vmem:[#allocation10_spill] sm:$0xff] }
  0xff   :  { %1882 = vpow2.f32 %v1790_v51 }
 0x100   :  { %1884 = vpow2.f32 %v1791_v60  ;;  %v3187_v60 = vld [vmem:[#allocation13_spill] sm:$0xff] }
 0x10a   :  { %v1881_v50 = vpop.eup %1880 }
 0x10b   :  { %v265_v54 = vadd.f32 1.0, %v1881_v50 }
 0x10c   :  { %v1883_v55 = vpop.eup %1882 }
 0x10d   :  { %1886 = vrcp.f32 %v265_v54  ;;  %v274_v52 = vadd.f32 1.0, %v1883_v55  ;;  %v1885_v53 = vpop.eup %1884  ;;  %v3189_v54 = vld [vmem:[#allocation15_spill] sm:$0xff]  ;;  %v3190_v55 = vld [vmem:[#allocation16_spill] sm:$0xff] }
 0x10e   :  { %1888 = vtanh.f32 %v277_v61  ;;  %v285_v56 = vadd.f32 1.0, %v1885_v53  ;;  %v3188_v61 = vld [vmem:[#allocation14_spill] sm:$0xff] }
 0x10f   :  { %1890 = vrcp.f32 %v274_v52  ;;  %v3191_v52 = vld [vmem:[#allocation17_spill] sm:$0xff]  ;;  %v3192_v53 = vld [vmem:[#allocation18_spill] sm:$0xff] }
 0x110   :  { %1892 = vrcp.f32 %v285_v56  ;;  %v3196_v56 = vld [vmem:[#allocation22_spill] sm:$0xff] }
 0x11a   :  { %v1887_v63 = vpop.eup %1886 }
 0x11b   :  { %v1889_v0 = vpop.eup %1888 }
 0x11c   :  { %v1891_v2 = vpop.eup %1890  ;;  %v289_v59 = vmul.f32 %v1889_v0, %v1887_v63  ;;  %v3193_v63 = vld [vmem:[#allocation19_spill] sm:$0xff]  ;;  %v3194_v0 = vld [vmem:[#allocation20_spill] sm:$0xff] }
 0x11d   :  { %v288_v58 = vmul.f32 0.0, %v1891_v2  ;;  %v1893_v1 = vpop.eup %1892  ;;  %v3195_v2 = vld [vmem:[#allocation21_spill] sm:$0xff] }
 0x11f   :  { %v2422_v57 = vadd.f32 %v289_v59, %v288_v58  ;;  %v3197_v58 = vld [vmem:[#allocation23_spill] sm:$0xff]  ;;  %v3198_v59 = vld [vmem:[#allocation24_spill] sm:$0xff] }
 0x121   :  { %1894 = vtanh.f32 %v2422_v57 }
 0x12e   :  { %v1895_v50 = vpop.eup %1894 }
 0x12f   :  { %v292_v51 = vmul.f32 %v1895_v50, %v1893_v1  ;;  %v3199_v1 = vld [vmem:[#allocation25_spill] sm:$0xff]  ;;  %v3200_v50 = vld [vmem:[#allocation26_spill] sm:$0xff] }
 0x131   :  { %360 = vmatmul.mubr.f32.vlgmr.msra.gmra.mxu0 %v292_v51  ;;  %431 = vmatmul.mubr.f32.vlgmr.msra.gmra.mxu1 %v292_v51  ;;  %v3201_v51 = vmov 0.0  }
 0x132   :  { %494 = vmatpush1.msra.mxu0 %v2157_v3  ;;  %565 = vmatpush1.msra.mxu1 %v2161_v4 }
 0x133   :  { %495 = vmatprep.subr.mxu0 %v2163_v5  ;;  %566 = vmatprep.subr.mxu1 %v2165_v6 }
 0x134   :  { %496 = vmatpush1.msra.mxu0 %v2169_v7  ;;  %567 = vmatpush1.msra.mxu1 %v2171_v8 }
 0x135   :  { %497 = vmatprep.subr.mxu0 %v2173_v9  ;;  %568 = vmatprep.subr.mxu1 %v2177_v10 }
 0x136   :  { %498 = vmatpush1.msra.mxu0 %v2179_v11  ;;  %569 = vmatpush1.msra.mxu1 %v2181_v12 }
 0x137   :  { %499 = vmatprep.subr.mxu0 %v2185_v13  ;;  %570 = vmatprep.subr.mxu1 %v2187_v14 }
 0x138   :  { %500 = vmatpush1.msra.mxu0 %v2191_v15  ;;  %571 = vmatpush1.msra.mxu1 %v2193_v16 }
 0x139   :  { %501 = vmatprep.subr.mxu0 %v2197_v17  ;;  %572 = vmatprep.subr.mxu1 %v2199_v18 }
 0x13a   :  { %502 = vmatpush1.msra.mxu0 %v2203_v19  ;;  %573 = vmatpush1.msra.mxu1 %v2205_v20 }
 0x13b   :  { %503 = vmatprep.subr.mxu0 %v2209_v21  ;;  %574 = vmatprep.subr.mxu1 %v2211_v22 }
 0x13c   :  { %504 = vmatpush1.msra.mxu0 %v2215_v23  ;;  %575 = vmatpush1.msra.mxu1 %v2217_v24 }
 0x13d   :  { %505 = vmatprep.subr.mxu0 %v2221_v25  ;;  %576 = vmatprep.subr.mxu1 %v2223_v26 }
 0x13e   :  { %506 = vmatpush1.msra.mxu0 %v2227_v27  ;;  %577 = vmatpush1.msra.mxu1 %v2229_v28 }
 0x13f   :  { %507 = vmatprep.subr.mxu0 %v2233_v29  ;;  %578 = vmatprep.subr.mxu1 %v2235_v30 }
 0x140   :  { %508 = vmatpush1.msra.mxu0 %v2239_v31  ;;  %579 = vmatpush1.msra.mxu1 %v2241_v32 }
 0x141   :  { %509 = vmatprep.subr.mxu0 %v2245_v33  ;;  %580 = vmatprep.subr.mxu1 %v2247_v34 }
 0x142   :  { %510 = vmatpush1.msra.mxu0 %v2251_v35  ;;  %581 = vmatpush1.msra.mxu1 %v2253_v36 }
 0x143   :  { %511 = vmatprep.subr.mxu0 %v2257_v37  ;;  %582 = vmatprep.subr.mxu1 %v2259_v38 }
 0x144   :  { %512 = vmatpush1.msra.mxu0 %v2263_v39  ;;  %583 = vmatpush1.msra.mxu1 %v2265_v40 }
 0x145   :  { %513 = vmatprep.subr.mxu0 %v2269_v41  ;;  %584 = vmatprep.subr.mxu1 %v2271_v42 }
 0x146   :  { %514 = vmatpush1.msra.mxu0 %v2275_v43  ;;  %585 = vmatpush1.msra.mxu1 %v2277_v44 }
 0x147   :  { %515 = vmatprep.subr.mxu0 %v3186_v45  ;;  %586 = vmatprep.subr.mxu1 %v2283_v46 }
 0x148   :  { %516 = vmatpush1.msra.mxu0 %v2287_v47  ;;  %587 = vmatpush1.msra.mxu1 %v2289_v48 }
 0x149   :  { %517 = vmatprep.subr.mxu0 %v2293_v49  ;;  %588 = vmatprep.subr.mxu1 %v3187_v60 }
 0x14a   :  { %518 = vmatpush1.msra.mxu0 %v3188_v61  ;;  %589 = vmatpush1.msra.mxu1 %v3189_v54 }
 0x14b   :  { %519 = vmatprep.subr.mxu0 %v3190_v55  ;;  %590 = vmatprep.subr.mxu1 %v3191_v52  ;;  %v3202_v52 = vld [vmem:[#allocation27_spill] sm:$0xff] }
 0x14c   :  { %520 = vmatpush1.msra.mxu0 %v3192_v53  ;;  %591 = vmatpush1.msra.mxu1 %v3193_v63  ;;  %v3203_v63 = vld [vmem:[#allocation8_spill] sm:$0xff] }
 0x14d   :  { %521 = vmatprep.subr.mxu0 %v3194_v0  ;;  %592 = vmatprep.subr.mxu1 %v3195_v2  ;;  %v3204_v0 = vld [vmem:[#allocation9_spill] sm:$0xff] }
 0x14e   :  { %522 = vmatpush1.msra.mxu0 %v3196_v56  ;;  %593 = vmatpush1.msra.mxu1 %v3197_v58 }
 0x14f   :  { %523 = vmatprep.subr.mxu0 %v3198_v59  ;;  %594 = vmatprep.subr.mxu1 %v3199_v1 }
 0x150   :  { %524 = vmatpush1.msra.mxu0 %v3200_v50  ;;  %557 = vmatprep.mubr.f32.mxu0 %v3201_v51 }
 0x151   :  { %595 = vmatpush1.msra.mxu1 %v3202_v52  ;;  %628 = vmatprep.mubr.f32.mxu1 %v3201_v51  ;;  %v1792_v52 = vld [vmem:[%s3078_s0 + $0x8] sm:$0xff] }
 0x152   :  { %691 = vmatprep.subr.mxu0 %v3203_v63  ;;  %762 = vmatprep.subr.mxu1 %v3204_v0 }
 0x1f1   :  { %v361_v2 = vpop.f32.mrf.mxu0  ;;  %v432_v56 = vpop.f32.mrf.mxu1 }
 0x1f3   :  { %v363_v53 = vpop.f32.mrf.mxu0  ;;  %v434_v58 = vpop.f32.mrf.mxu1 }
 0x1f4   :  { %v441_v55 = vcombine.low %v361_v2, %v363_v53  ;;  %v442_v59 = vcombine.low %v432_v56, %v434_v58 }
 0x1f6   :  { %v449_v1 = vrot.slane %v441_v55, %v2415_v62  ;;  %v456_v50 = vrot.slane %v442_v59, %v2415_v62 }
 0x1f8   :  { %v457_v54 = vcombine.low %v449_v1, %v456_v50  ;;  %v3206_v50 = vld [vmem:[#allocation12_spill] sm:$0xff] }
 0x1fa   :  { %v459_v51 = vadd.f32 %v1792_v52, %v457_v54 }
 0x1fc   :  { %v1793_v61 = vmul.f32 -1.442695, %v459_v51  ;;  %v467_v63 = vrot.slane %v459_v51, 2  ;;  %v478_v60 = vrot.slane %v459_v51, 6  ;;  %v475_v53 = vrot.slane %v459_v51, 4  ;;  %v3207_v51 = vld [vmem:[#allocation13_spill] sm:$0xff] }
 0x1fe   :  { %1896 = vpow2.f32 %v1793_v61  ;;  %v1794_v0 = vmul.f32 -1.442695, %v467_v63  ;;  %v1795_v49 = vmul.f32 -1.442695, %v478_v60 }
 0x200   :  { %1898 = vpow2.f32 %v1794_v0 }
 0x201   :  { %1900 = vpow2.f32 %v1795_v49 }
 0x20b   :  { %v1897_v48 = vpop.eup %1896 }
 0x20c   :  { %v463_v2 = vadd.f32 1.0, %v1897_v48 }
 0x20d   :  { %v1899_v56 = vpop.eup %1898 }
 0x20e   :  { %1902 = vrcp.f32 %v463_v2  ;;  %v472_v55 = vadd.f32 1.0, %v1899_v56  ;;  %v1901_v58 = vpop.eup %1900  ;;  %v3209_v2 = vld [vmem:[#allocation15_spill] sm:$0xff]  ;;  %v3210_v56 = vld [vmem:[#allocation16_spill] sm:$0xff] }
 0x20f   :  { %1904 = vtanh.f32 %v475_v53  ;;  %v483_v52 = vadd.f32 1.0, %v1901_v58  ;;  %v3208_v53 = vld [vmem:[#allocation14_spill] sm:$0xff] }
 0x210   :  { %1906 = vrcp.f32 %v472_v55  ;;  %v3211_v55 = vld [vmem:[#allocation17_spill] sm:$0xff]  ;;  %v3212_v58 = vld [vmem:[#allocation18_spill] sm:$0xff] }
 0x211   :  { %1908 = vrcp.f32 %v483_v52  ;;  %v3216_v52 = vld [vmem:[#allocation22_spill] sm:$0xff] }
 0x21b   :  { %v1903_v59 = vpop.eup %1902 }
 0x21c   :  { %v1905_v1 = vpop.eup %1904 }
 0x21d   :  { %v1907_v54 = vpop.eup %1906  ;;  %v487_v63 = vmul.f32 %v1905_v1, %v1903_v59  ;;  %v3213_v59 = vld [vmem:[#allocation19_spill] sm:$0xff]  ;;  %v3214_v1 = vld [vmem:[#allocation20_spill] sm:$0xff] }
 0x21e   :  { %v486_v61 = vmul.f32 %v1907_v54, %v2422_v57  ;;  %v1909_v48 = vpop.eup %1908  ;;  %v3205_v57 = vld [vmem:[#allocation11_spill] sm:$0xff]  ;;  %v3215_v54 = vld [vmem:[#allocation21_spill] sm:$0xff] }
 0x220   :  { %v2497_v0 = vadd.f32 %v487_v63, %v486_v61  ;;  %v3217_v61 = vld [vmem:[#allocation23_spill] sm:$0xff]  ;;  %v3218_v63 = vld [vmem:[#allocation24_spill] sm:$0xff] }
 0x222   :  { %1910 = vtanh.f32 %v2497_v0 }
 0x22f   :  { %v1911_v60 = vpop.eup %1910 }
 0x230   :  { %v490_v49 = vmul.f32 %v1911_v60, %v1909_v48  ;;  %v3219_v48 = vld [vmem:[#allocation25_spill] sm:$0xff]  ;;  %v3220_v60 = vld [vmem:[#allocation26_spill] sm:$0xff] }
 0x232   :  { %558 = vmatmul.mubr.f32.vlgmr.msra.gmra.mxu0 %v490_v49  ;;  %629 = vmatmul.mubr.f32.vlgmr.msra.gmra.mxu1 %v490_v49  ;;  %v3221_v49 = vmov 0.0  }
 0x233   :  { %692 = vmatpush1.msra.mxu0 %v2157_v3  ;;  %763 = vmatpush1.msra.mxu1 %v2161_v4 }
 0x234   :  { %693 = vmatprep.subr.mxu0 %v2163_v5  ;;  %764 = vmatprep.subr.mxu1 %v2165_v6 }
 0x235   :  { %694 = vmatpush1.msra.mxu0 %v2169_v7  ;;  %765 = vmatpush1.msra.mxu1 %v2171_v8 }
 0x236   :  { %695 = vmatprep.subr.mxu0 %v2173_v9  ;;  %766 = vmatprep.subr.mxu1 %v2177_v10 }
 0x237   :  { %696 = vmatpush1.msra.mxu0 %v2179_v11  ;;  %767 = vmatpush1.msra.mxu1 %v2181_v12 }
 0x238   :  { %697 = vmatprep.subr.mxu0 %v2185_v13  ;;  %768 = vmatprep.subr.mxu1 %v2187_v14 }
 0x239   :  { %698 = vmatpush1.msra.mxu0 %v2191_v15  ;;  %769 = vmatpush1.msra.mxu1 %v2193_v16 }
 0x23a   :  { %699 = vmatprep.subr.mxu0 %v2197_v17  ;;  %770 = vmatprep.subr.mxu1 %v2199_v18 }
 0x23b   :  { %700 = vmatpush1.msra.mxu0 %v2203_v19  ;;  %771 = vmatpush1.msra.mxu1 %v2205_v20 }
 0x23c   :  { %701 = vmatprep.subr.mxu0 %v2209_v21  ;;  %772 = vmatprep.subr.mxu1 %v2211_v22 }
 0x23d   :  { %702 = vmatpush1.msra.mxu0 %v2215_v23  ;;  %773 = vmatpush1.msra.mxu1 %v2217_v24 }
 0x23e   :  { %703 = vmatprep.subr.mxu0 %v2221_v25  ;;  %774 = vmatprep.subr.mxu1 %v2223_v26 }
 0x23f   :  { %704 = vmatpush1.msra.mxu0 %v2227_v27  ;;  %775 = vmatpush1.msra.mxu1 %v2229_v28 }
 0x240   :  { %705 = vmatprep.subr.mxu0 %v2233_v29  ;;  %776 = vmatprep.subr.mxu1 %v2235_v30 }
 0x241   :  { %706 = vmatpush1.msra.mxu0 %v2239_v31  ;;  %777 = vmatpush1.msra.mxu1 %v2241_v32 }
 0x242   :  { %707 = vmatprep.subr.mxu0 %v2245_v33  ;;  %778 = vmatprep.subr.mxu1 %v2247_v34 }
 0x243   :  { %708 = vmatpush1.msra.mxu0 %v2251_v35  ;;  %779 = vmatpush1.msra.mxu1 %v2253_v36 }
 0x244   :  { %709 = vmatprep.subr.mxu0 %v2257_v37  ;;  %780 = vmatprep.subr.mxu1 %v2259_v38 }
 0x245   :  { %710 = vmatpush1.msra.mxu0 %v2263_v39  ;;  %781 = vmatpush1.msra.mxu1 %v2265_v40 }
 0x246   :  { %711 = vmatprep.subr.mxu0 %v2269_v41  ;;  %782 = vmatprep.subr.mxu1 %v2271_v42 }
 0x247   :  { %712 = vmatpush1.msra.mxu0 %v2275_v43  ;;  %783 = vmatpush1.msra.mxu1 %v2277_v44 }
 0x248   :  { %713 = vmatprep.subr.mxu0 %v3186_v45  ;;  %784 = vmatprep.subr.mxu1 %v2283_v46 }
 0x249   :  { %714 = vmatpush1.msra.mxu0 %v2287_v47  ;;  %785 = vmatpush1.msra.mxu1 %v3205_v57 }
 0x24a   :  { %715 = vmatprep.subr.mxu0 %v3206_v50  ;;  %786 = vmatprep.subr.mxu1 %v3207_v51 }
 0x24b   :  { %716 = vmatpush1.msra.mxu0 %v3208_v53  ;;  %787 = vmatpush1.msra.mxu1 %v3209_v2 }
 0x24c   :  { %717 = vmatprep.subr.mxu0 %v3210_v56  ;;  %788 = vmatprep.subr.mxu1 %v3211_v55  ;;  %v3222_v55 = vld [vmem:[#allocation27_spill] sm:$0xff] }
 0x24d   :  { %718 = vmatpush1.msra.mxu0 %v3212_v58  ;;  %789 = vmatpush1.msra.mxu1 %v3213_v59  ;;  %v3223_v59 = vld [vmem:[#allocation8_spill] sm:$0xff] }
 0x24e   :  { %719 = vmatprep.subr.mxu0 %v3214_v1  ;;  %790 = vmatprep.subr.mxu1 %v3215_v54  ;;  %v3224_v1 = vld [vmem:[#allocation9_spill] sm:$0xff] }
 0x24f   :  { %720 = vmatpush1.msra.mxu0 %v3216_v52  ;;  %791 = vmatpush1.msra.mxu1 %v3217_v61 }
 0x250   :  { %721 = vmatprep.subr.mxu0 %v3218_v63  ;;  %792 = vmatprep.subr.mxu1 %v3219_v48 }
 0x251   :  { %722 = vmatpush1.msra.mxu0 %v3220_v60  ;;  %755 = vmatprep.mubr.f32.mxu0 %v3221_v49 }
 0x252   :  { %793 = vmatpush1.msra.mxu1 %v3222_v55  ;;  %826 = vmatprep.mubr.f32.mxu1 %v3221_v49  ;;  %v1796_v55 = vld [vmem:[%s3078_s0 + $0x10] sm:$0xff] }
 0x253   :  { %889 = vmatprep.subr.mxu0 %v3223_v59  ;;  %960 = vmatprep.subr.mxu1 %v3224_v1 }
 0x2f2   :  { %v559_v54 = vpop.f32.mrf.mxu0  ;;  %v630_v52 = vpop.f32.mrf.mxu1 }
 0x2f4   :  { %v561_v58 = vpop.f32.mrf.mxu0  ;;  %v632_v61 = vpop.f32.mrf.mxu1 }
 0x2f5   :  { %v639_v56 = vcombine.low %v559_v54, %v561_v58  ;;  %v640_v63 = vcombine.low %v630_v52, %v632_v61 }
 0x2f7   :  { %v647_v48 = vrot.slane %v639_v56, %v2415_v62  ;;  %v654_v60 = vrot.slane %v640_v63, %v2415_v62 }
 0x2f9   :  { %v655_v2 = vcombine.low %v647_v48, %v654_v60 }
 0x2fb   :  { %v657_v49 = vadd.f32 %v1796_v55, %v655_v2 }
 0x2fd   :  { %v1797_v53 = vmul.f32 -1.442695, %v657_v49  ;;  %v665_v59 = vrot.slane %v657_v49, 2  ;;  %v676_v51 = vrot.slane %v657_v49, 6  ;;  %v673_v58 = vrot.slane %v657_v49, 4 }
 0x2ff   :  { %1912 = vpow2.f32 %v1797_v53  ;;  %v1798_v1 = vmul.f32 -1.442695, %v665_v59  ;;  %v1799_v50 = vmul.f32 -1.442695, %v676_v51 }
 0x301   :  { %1914 = vpow2.f32 %v1798_v1 }
 0x302   :  { %1916 = vpow2.f32 %v1799_v50 }
 0x30c   :  { %v1913_v57 = vpop.eup %1912 }
 0x30d   :  { %v661_v54 = vadd.f32 1.0, %v1913_v57 }
 0x30e   :  { %v1915_v52 = vpop.eup %1914 }
 0x30f   :  { %1918 = vrcp.f32 %v661_v54  ;;  %v670_v56 = vadd.f32 1.0, %v1915_v52  ;;  %v1917_v61 = vpop.eup %1916 }
 0x310   :  { %1920 = vtanh.f32 %v673_v58  ;;  %v681_v55 = vadd.f32 1.0, %v1917_v61  ;;  %v2654_v61 = vld [vmem:[#allocation2 + $0x1e0] sm:$0xff] }
 0x311   :  { %1922 = vrcp.f32 %v670_v56 }
 0x312   :  { %1924 = vrcp.f32 %v681_v55  ;;  %v2666_v55 = vld [vmem:[#allocation2 + $0x1c0] sm:$0xff] }
 0x31c   :  { %v1919_v63 = vpop.eup %1918 }
 0x31d   :  { %v1921_v48 = vpop.eup %1920 }
 0x31e   :  { %v1923_v2 = vpop.eup %1922  ;;  %v685_v60 = vmul.f32 %v1921_v48, %v1919_v63  ;;  %v2657_v63 = vld [vmem:[#allocation2 + $0x1f0] sm:$0xff]  ;;  %v2660_v48 = vld [vmem:[#allocation2 + $0x1c8] sm:$0xff] }
 0x31f   :  { %v684_v53 = vmul.f32 %v1923_v2, %v2497_v0  ;;  %v1925_v57 = vpop.eup %1924  ;;  %v2663_v2 = vld [vmem:[#allocation2 + $0x1d8] sm:$0xff] }
 0x321   :  { %v2572_v59 = vadd.f32 %v685_v60, %v684_v53  ;;  %v2669_v53 = vld [vmem:[#allocation2 + $0x1d0] sm:$0xff]  ;;  %v2672_v60 = vld [vmem:[#allocation2 + $0x1a8] sm:$0xff] }
 0x323   :  { %1926 = vtanh.f32 %v2572_v59 }
 0x330   :  { %v1927_v51 = vpop.eup %1926 }
 0x331   :  { %v688_v50 = vmul.f32 %v1927_v51, %v1925_v57  ;;  %v2678_v57 = vld [vmem:[#allocation2 + $0x1a0] sm:$0xff]  ;;  %v2681_v51 = vld [vmem:[#allocation2 + $0x1b0] sm:$0xff] }
 0x333   :  { %756 = vmatmul.mubr.f32.vlgmr.msra.gmra.mxu0 %v688_v50  ;;  %827 = vmatmul.mubr.f32.vlgmr.msra.gmra.mxu1 %v688_v50  ;;  %v2684_v50 = vld [vmem:[#allocation2 + $0x188] sm:$0xff] }
 0x334   :  { %890 = vmatpush1.msra.mxu0 %v2157_v3  ;;  %961 = vmatpush1.msra.mxu1 %v2161_v4  ;;  %v3225_v3 = vld [vmem:[#allocation11_spill] sm:$0xff]  ;;  %v3226_v4 = vld [vmem:[#allocation12_spill] sm:$0xff] }
 0x335   :  { %891 = vmatprep.subr.mxu0 %v2163_v5  ;;  %962 = vmatprep.subr.mxu1 %v2165_v6  ;;  %v3227_v5 = vld [vmem:[#allocation13_spill] sm:$0xff]  ;;  %v3228_v6 = vld [vmem:[#allocation14_spill] sm:$0xff] }
 0x336   :  { %892 = vmatpush1.msra.mxu0 %v2169_v7  ;;  %963 = vmatpush1.msra.mxu1 %v2171_v8  ;;  %v3229_v7 = vld [vmem:[#allocation15_spill] sm:$0xff]  ;;  %v3230_v8 = vld [vmem:[#allocation16_spill] sm:$0xff] }
 0x337   :  { %893 = vmatprep.subr.mxu0 %v2173_v9  ;;  %964 = vmatprep.subr.mxu1 %v2177_v10  ;;  %v3231_v9 = vld [vmem:[#allocation17_spill] sm:$0xff]  ;;  %v3232_v10 = vld [vmem:[#allocation18_spill] sm:$0xff] }
 0x338   :  { %894 = vmatpush1.msra.mxu0 %v2179_v11  ;;  %965 = vmatpush1.msra.mxu1 %v2181_v12  ;;  %v3233_v11 = vld [vmem:[#allocation19_spill] sm:$0xff]  ;;  %v3234_v12 = vld [vmem:[#allocation20_spill] sm:$0xff] }
 0x339   :  { %895 = vmatprep.subr.mxu0 %v2185_v13  ;;  %966 = vmatprep.subr.mxu1 %v2187_v14  ;;  %v3235_v13 = vld [vmem:[#allocation21_spill] sm:$0xff]  ;;  %v3236_v14 = vld [vmem:[#allocation22_spill] sm:$0xff] }
 0x33a   :  { %896 = vmatpush1.msra.mxu0 %v2191_v15  ;;  %967 = vmatpush1.msra.mxu1 %v2193_v16  ;;  %v3237_v15 = vld [vmem:[#allocation23_spill] sm:$0xff]  ;;  %v3238_v16 = vld [vmem:[#allocation24_spill] sm:$0xff] }
 0x33b   :  { %897 = vmatprep.subr.mxu0 %v2197_v17  ;;  %968 = vmatprep.subr.mxu1 %v2199_v18  ;;  %v3239_v17 = vld [vmem:[#allocation25_spill] sm:$0xff]  ;;  %v3240_v18 = vld [vmem:[#allocation26_spill] sm:$0xff] }
 0x33c   :  { %898 = vmatpush1.msra.mxu0 %v2203_v19  ;;  %969 = vmatpush1.msra.mxu1 %v2205_v20  ;;  %v3241_v19 = vmov 0.0   ;;  %v3242_v20 = vld [vmem:[#allocation27_spill] sm:$0xff] }
 0x33d   :  { %899 = vmatprep.subr.mxu0 %v2209_v21  ;;  %970 = vmatprep.subr.mxu1 %v2211_v22  ;;  %v2639_v21 = vld [vmem:[#allocation2 + $0x1e8] sm:$0xff]  ;;  %v2642_v22 = vld [vmem:[#allocation2 + $0x1f8] sm:$0xff] }
 0x33e   :  { %900 = vmatpush1.msra.mxu0 %v2215_v23  ;;  %971 = vmatpush1.msra.mxu1 %v2217_v24  ;;  %3243 = vst [vmem:[#allocation10_spill] sm:$0xff] %v2639_v21  ;;  %3244 = vst [vmem:[#allocation8_spill] sm:$0xff] %v2642_v22 }
 0x33f   :  { %901 = vmatprep.subr.mxu0 %v2221_v25  ;;  %972 = vmatprep.subr.mxu1 %v2223_v26 }
 0x340   :  { %902 = vmatpush1.msra.mxu0 %v2227_v27  ;;  %973 = vmatpush1.msra.mxu1 %v2229_v28 }
 0x341   :  { %903 = vmatprep.subr.mxu0 %v2233_v29  ;;  %974 = vmatprep.subr.mxu1 %v2235_v30 }
 0x342   :  { %904 = vmatpush1.msra.mxu0 %v2239_v31  ;;  %975 = vmatpush1.msra.mxu1 %v2241_v32  ;;  %v1800_v31 = vld [vmem:[%s3078_s0 + $0x18] sm:$0xff] }
 0x343   :  { %905 = vmatprep.subr.mxu0 %v2245_v33  ;;  %976 = vmatprep.subr.mxu1 %v2247_v34 }
 0x344   :  { %906 = vmatpush1.msra.mxu0 %v2251_v35  ;;  %977 = vmatpush1.msra.mxu1 %v2253_v36 }
 0x345   :  { %907 = vmatprep.subr.mxu0 %v2257_v37  ;;  %978 = vmatprep.subr.mxu1 %v2259_v38 }
 0x346   :  { %908 = vmatpush1.msra.mxu0 %v2263_v39  ;;  %979 = vmatpush1.msra.mxu1 %v2265_v40 }
 0x347   :  { %909 = vmatprep.subr.mxu0 %v2269_v41  ;;  %980 = vmatprep.subr.mxu1 %v2271_v42 }
 0x348   :  { %910 = vmatpush1.msra.mxu0 %v2275_v43  ;;  %981 = vmatpush1.msra.mxu1 %v2277_v44 }
 0x349   :  { %911 = vmatprep.subr.mxu0 %v3186_v45  ;;  %982 = vmatprep.subr.mxu1 %v2283_v46 }
 0x34a   :  { %912 = vmatpush1.msra.mxu0 %v2287_v47  ;;  %983 = vmatpush1.msra.mxu1 %v3225_v3  ;;  %v2687_v3 = vld [vmem:[#allocation2 + $0x198] sm:$0xff] }
 0x34b   :  { %913 = vmatprep.subr.mxu0 %v3226_v4  ;;  %984 = vmatprep.subr.mxu1 %v3227_v5  ;;  %v2690_v4 = vld [vmem:[#allocation2 + $0x180] sm:$0xff]  ;;  %v2693_v5 = vld [vmem:[#allocation2 + $0x190] sm:$0xff] }
 0x34c   :  { %914 = vmatpush1.msra.mxu0 %v3228_v6  ;;  %985 = vmatpush1.msra.mxu1 %v3229_v7  ;;  %v2696_v6 = vld [vmem:[#allocation2 + $0x168] sm:$0xff]  ;;  %v2699_v7 = vld [vmem:[#allocation2 + $0x178] sm:$0xff] }
 0x34d   :  { %915 = vmatprep.subr.mxu0 %v3230_v8  ;;  %986 = vmatprep.subr.mxu1 %v3231_v9  ;;  %v2702_v8 = vld [vmem:[#allocation2 + $0x160] sm:$0xff]  ;;  %v2705_v9 = vld [vmem:[#allocation2 + $0x170] sm:$0xff] }
 0x34e   :  { %916 = vmatpush1.msra.mxu0 %v3232_v10  ;;  %987 = vmatpush1.msra.mxu1 %v3233_v11  ;;  %v2708_v10 = vld [vmem:[#allocation2 + $0x148] sm:$0xff]  ;;  %v2711_v11 = vld [vmem:[#allocation2 + $0x158] sm:$0xff] }
 0x34f   :  { %917 = vmatprep.subr.mxu0 %v3234_v12  ;;  %988 = vmatprep.subr.mxu1 %v3235_v13  ;;  %v2714_v12 = vld [vmem:[#allocation2 + $0x140] sm:$0xff]  ;;  %v2717_v13 = vld [vmem:[#allocation2 + $0x150] sm:$0xff] }
 0x350   :  { %918 = vmatpush1.msra.mxu0 %v3236_v14  ;;  %989 = vmatpush1.msra.mxu1 %v3237_v15  ;;  %v2720_v14 = vld [vmem:[#allocation2 + $0x128] sm:$0xff]  ;;  %v2723_v15 = vld [vmem:[#allocation2 + $0x138] sm:$0xff] }
 0x351   :  { %919 = vmatprep.subr.mxu0 %v3238_v16  ;;  %990 = vmatprep.subr.mxu1 %v3239_v17  ;;  %v2726_v16 = vld [vmem:[#allocation2 + $0x120] sm:$0xff]  ;;  %v2729_v17 = vld [vmem:[#allocation2 + $0x130] sm:$0xff] }
 0x352   :  { %920 = vmatpush1.msra.mxu0 %v3240_v18  ;;  %953 = vmatprep.mubr.f32.mxu0 %v3241_v19 }
 0x353   :  { %991 = vmatpush1.msra.mxu1 %v3242_v20  ;;  %1024 = vmatprep.mubr.f32.mxu1 %v3241_v19 }
 0x354   :  { %1087 = vmatprep.subr.mxu0 %v2639_v21  ;;  %1158 = vmatprep.subr.mxu1 %v2642_v22 }
 0x3f3   :  { %v757_v23 = vpop.f32.mrf.mxu0  ;;  %v828_v24 = vpop.f32.mrf.mxu1 }
 0x3f5   :  { %v759_v25 = vpop.f32.mrf.mxu0  ;;  %v830_v26 = vpop.f32.mrf.mxu1 }
 0x3f6   :  { %v837_v27 = vcombine.low %v757_v23, %v759_v25  ;;  %v838_v28 = vcombine.low %v828_v24, %v830_v26  ;;  %v2732_v23 = vld [vmem:[#allocation2 + $0x108] sm:$0xff]  ;;  %v2735_v24 = vld [vmem:[#allocation2 + $0x118] sm:$0xff]  ;;  %v2738_v25 = vld [vmem:[#allocation2 + $0x100] sm:$0xff] }
 0x3f7   :  { %v2741_v26 = vld [vmem:[#allocation2 + $0x110] sm:$0xff] }
 0x3f8   :  { %v845_v29 = vrot.slane %v837_v27, %v2415_v62  ;;  %v852_v30 = vrot.slane %v838_v28, %v2415_v62  ;;  %v2744_v27 = vld [vmem:[#allocation2 + $0xe8] sm:$0xff]  ;;  %v2747_v28 = vld [vmem:[#allocation2 + $0xf8] sm:$0xff] }
 0x3fa   :  { %v853_v32 = vcombine.low %v845_v29, %v852_v30  ;;  %v2750_v29 = vld [vmem:[#allocation2 + $0xe0] sm:$0xff]  ;;  %v2753_v30 = vld [vmem:[#allocation2 + $0xf0] sm:$0xff] }
 0x3fc   :  { %v855_v33 = vadd.f32 %v1800_v31, %v853_v32  ;;  %v2756_v31 = vld [vmem:[#allocation2 + $0xc8] sm:$0xff]  ;;  %v2759_v32 = vld [vmem:[#allocation2 + $0xd8] sm:$0xff] }
 0x3fe   :  { %v1801_v34 = vmul.f32 -1.442695, %v855_v33  ;;  %v863_v35 = vrot.slane %v855_v33, 2  ;;  %v874_v37 = vrot.slane %v855_v33, 6  ;;  %v871_v40 = vrot.slane %v855_v33, 4  ;;  %v2762_v33 = vld [vmem:[#allocation2 + $0xc0] sm:$0xff] }
 0x400   :  { %1928 = vpow2.f32 %v1801_v34  ;;  %v1802_v36 = vmul.f32 -1.442695, %v863_v35  ;;  %v1803_v38 = vmul.f32 -1.442695, %v874_v37  ;;  %v2765_v34 = vld [vmem:[#allocation2 + $0xd0] sm:$0xff]  ;;  %v2768_v35 = vld [vmem:[#allocation2 + $0xa8] sm:$0xff] }
 0x401   :  { %v2774_v37 = vld [vmem:[#allocation2 + $0xa0] sm:$0xff] }
 0x402   :  { %1930 = vpow2.f32 %v1802_v36  ;;  %v2771_v36 = vld [vmem:[#allocation2 + $0xb8] sm:$0xff] }
 0x403   :  { %1932 = vpow2.f32 %v1803_v38  ;;  %v2777_v38 = vld [vmem:[#allocation2 + $0xb0] sm:$0xff] }
 0x40d   :  { %v1929_v39 = vpop.eup %1928 }
 0x40e   :  { %v859_v41 = vadd.f32 1.0, %v1929_v39  ;;  %v2780_v39 = vld [vmem:[#allocation2 + $0x88] sm:$0xff] }
 0x40f   :  { %v1931_v42 = vpop.eup %1930 }
 0x410   :  { %1934 = vrcp.f32 %v859_v41  ;;  %v868_v43 = vadd.f32 1.0, %v1931_v42  ;;  %v1933_v44 = vpop.eup %1932  ;;  %v2786_v41 = vld [vmem:[#allocation2 + $0x80] sm:$0xff]  ;;  %v2789_v42 = vld [vmem:[#allocation2 + $0x90] sm:$0xff] }
 0x411   :  { %1936 = vtanh.f32 %v871_v40  ;;  %v879_v0 = vadd.f32 1.0, %v1933_v44  ;;  %v2783_v40 = vld [vmem:[#allocation2 + $0x98] sm:$0xff]  ;;  %3245 = vst [vmem:[#allocation9_spill] sm:$0xff] %v2789_v42 }
 0x412   :  { %1938 = vrcp.f32 %v868_v43  ;;  %v2792_v43 = vld [vmem:[#allocation2 + $0x68] sm:$0xff]  ;;  %v2795_v44 = vld [vmem:[#allocation2 + $0x78] sm:$0xff] }
 0x413   :  { %1940 = vrcp.f32 %v879_v0  ;;  %3246 = vst [vmem:[#allocation11_spill] sm:$0xff] %v2792_v43  ;;  %3247 = vst [vmem:[#allocation12_spill] sm:$0xff] %v2795_v44  ;;  %v2807_v0 = vld [vmem:[#allocation2 + $0x58] sm:$0xff] }
 0x414   :  { %3251 = vst [vmem:[#allocation16_spill] sm:$0xff] %v2807_v0 }
 0x41d   :  { %v1935_v46 = vpop.eup %1934 }
 0x41e   :  { %v1937_v47 = vpop.eup %1936 }
 0x41f   :  { %v1939_v45 = vpop.eup %1938  ;;  %v883_v1 = vmul.f32 %v1937_v47, %v1935_v46  ;;  %v2798_v46 = vld [vmem:[#allocation2 + $0x60] sm:$0xff]  ;;  %v2801_v47 = vld [vmem:[#allocation2 + $0x70] sm:$0xff] }
 0x420   :  { %v882_v49 = vmul.f32 %v1939_v45, %v2572_v59  ;;  %v1941_v54 = vpop.eup %1940  ;;  %v2675_v59 = vld [vmem:[#allocation2 + $0x1b8] sm:$0xff]  ;;  %3248 = vst [vmem:[#allocation13_spill] sm:$0xff] %v2798_v46  ;;  %3249 = vst [vmem:[#allocation14_spill] sm:$0xff] %v2801_v47  ;;  %v2804_v45 = vld [vmem:[#allocation2 + $0x48] sm:$0xff] }
 0x421   :  { %3250 = vst [vmem:[#allocation15_spill] sm:$0xff] %v2804_v45 }
 0x422   :  { %v2651_v58 = vadd.f32 %v883_v1, %v882_v49  ;;  %v2810_v49 = vld [vmem:[#allocation2 + $0x40] sm:$0xff]  ;;  %v2813_v1 = vld [vmem:[#allocation2 + $0x50] sm:$0xff] }
 0x423   :  { %3252 = vst [vmem:[#allocation17_spill] sm:$0xff] %v2810_v49  ;;  %3253 = vst [vmem:[#allocation18_spill] sm:$0xff] %v2813_v1 }
 0x424   :  { %1942 = vtanh.f32 %v2651_v58 }
 0x431   :  { %v1943_v52 = vpop.eup %1942 }
 0x432   :  { %v886_v56 = vmul.f32 %v1943_v52, %v1941_v54  ;;  %v2816_v54 = vld [vmem:[#allocation2 + $0x28] sm:$0xff]  ;;  %v2819_v52 = vld [vmem:[#allocation2 + $0x38] sm:$0xff] }
 0x433   :  { %3254 = vst [vmem:[#allocation19_spill] sm:$0xff] %v2816_v54  ;;  %3255 = vst [vmem:[#allocation20_spill] sm:$0xff] %v2819_v52 }
 0x434   :  { %954 = vmatmul.mubr.f32.vlgmr.msra.gmra.mxu0 %v886_v56  ;;  %1025 = vmatmul.mubr.f32.vlgmr.msra.gmra.mxu1 %v886_v56  ;;  %v2822_v56 = vld [vmem:[#allocation2 + $0x20] sm:$0xff] }
 0x435   :  { %1088 = vmatpush1.msra.mxu0 %v2654_v61  ;;  %1159 = vmatpush1.msra.mxu1 %v2657_v63  ;;  %3256 = vst [vmem:[#allocation21_spill] sm:$0xff] %v2822_v56 }
 0x436   :  { %1089 = vmatprep.subr.mxu0 %v2660_v48  ;;  %1160 = vmatprep.subr.mxu1 %v2663_v2 }
 0x437   :  { %1090 = vmatpush1.msra.mxu0 %v2666_v55  ;;  %1161 = vmatpush1.msra.mxu1 %v2669_v53 }
 0x438   :  { %1091 = vmatprep.subr.mxu0 %v2672_v60  ;;  %1162 = vmatprep.subr.mxu1 %v2675_v59 }
 0x439   :  { %1092 = vmatpush1.msra.mxu0 %v2678_v57  ;;  %1163 = vmatpush1.msra.mxu1 %v2681_v51 }
 0x43a   :  { %1093 = vmatprep.subr.mxu0 %v2684_v50  ;;  %1164 = vmatprep.subr.mxu1 %v2687_v3 }
 0x43b   :  { %1094 = vmatpush1.msra.mxu0 %v2690_v4  ;;  %1165 = vmatpush1.msra.mxu1 %v2693_v5 }
 0x43c   :  { %1095 = vmatprep.subr.mxu0 %v2696_v6  ;;  %1166 = vmatprep.subr.mxu1 %v2699_v7 }
 0x43d   :  { %1096 = vmatpush1.msra.mxu0 %v2702_v8  ;;  %1167 = vmatpush1.msra.mxu1 %v2705_v9 }
 0x43e   :  { %1097 = vmatprep.subr.mxu0 %v2708_v10  ;;  %1168 = vmatprep.subr.mxu1 %v2711_v11 }
 0x43f   :  { %1098 = vmatpush1.msra.mxu0 %v2714_v12  ;;  %1169 = vmatpush1.msra.mxu1 %v2717_v13 }
 0x440   :  { %1099 = vmatprep.subr.mxu0 %v2720_v14  ;;  %1170 = vmatprep.subr.mxu1 %v2723_v15 }
 0x441   :  { %1100 = vmatpush1.msra.mxu0 %v2726_v16  ;;  %1171 = vmatpush1.msra.mxu1 %v2729_v17 }
 0x442   :  { %1101 = vmatprep.subr.mxu0 %v2732_v23  ;;  %1172 = vmatprep.subr.mxu1 %v2735_v24 }
 0x443   :  { %1102 = vmatpush1.msra.mxu0 %v2738_v25  ;;  %1173 = vmatpush1.msra.mxu1 %v2741_v26 }
 0x444   :  { %1103 = vmatprep.subr.mxu0 %v2744_v27  ;;  %1174 = vmatprep.subr.mxu1 %v2747_v28 }
 0x445   :  { %1104 = vmatpush1.msra.mxu0 %v2750_v29  ;;  %1175 = vmatpush1.msra.mxu1 %v2753_v30 }
 0x446   :  { %1105 = vmatprep.subr.mxu0 %v2756_v31  ;;  %1176 = vmatprep.subr.mxu1 %v2759_v32 }
 0x447   :  { %1106 = vmatpush1.msra.mxu0 %v2762_v33  ;;  %1177 = vmatpush1.msra.mxu1 %v2765_v34 }
 0x448   :  { %1107 = vmatprep.subr.mxu0 %v2768_v35  ;;  %1178 = vmatprep.subr.mxu1 %v2771_v36 }
 0x449   :  { %1108 = vmatpush1.msra.mxu0 %v2774_v37  ;;  %1179 = vmatpush1.msra.mxu1 %v2777_v38 }
 0x44a   :  { %1109 = vmatprep.subr.mxu0 %v2780_v39  ;;  %1180 = vmatprep.subr.mxu1 %v2783_v40 }
 0x44b   :  { %1110 = vmatpush1.msra.mxu0 %v2786_v41  ;;  %1181 = vmatpush1.msra.mxu1 %v2789_v42 }
 0x44c   :  { %1111 = vmatprep.subr.mxu0 %v2792_v43  ;;  %1182 = vmatprep.subr.mxu1 %v2795_v44 }
 0x44d   :  { %1112 = vmatpush1.msra.mxu0 %v2798_v46  ;;  %1183 = vmatpush1.msra.mxu1 %v2801_v47 }
 0x44e   :  { %1113 = vmatprep.subr.mxu0 %v2804_v45  ;;  %1184 = vmatprep.subr.mxu1 %v2807_v0  ;;  %v2825_v0 = vld [vmem:[#allocation2 + $0x30] sm:$0xff] }
 0x44f   :  { %1114 = vmatpush1.msra.mxu0 %v2810_v49  ;;  %1185 = vmatpush1.msra.mxu1 %v2813_v1  ;;  %3257 = vst [vmem:[#allocation22_spill] sm:$0xff] %v2825_v0  ;;  %v2828_v49 = vld [vmem:[#allocation2 + $0x8] sm:$0xff]  ;;  %v2831_v1 = vld [vmem:[#allocation2 + $0x18] sm:$0xff] }
 0x450   :  { %1115 = vmatprep.subr.mxu0 %v2816_v54  ;;  %1186 = vmatprep.subr.mxu1 %v2819_v52  ;;  %3258 = vst [vmem:[#allocation23_spill] sm:$0xff] %v2828_v49  ;;  %3259 = vst [vmem:[#allocation24_spill] sm:$0xff] %v2831_v1 }
 0x451   :  { %1116 = vmatpush1.msra.mxu0 %v2822_v56  ;;  %1187 = vmatpush1.msra.mxu1 %v2825_v0 }
 0x452   :  { %1117 = vmatprep.subr.mxu0 %v2828_v49  ;;  %1188 = vmatprep.subr.mxu1 %v2831_v1 }
 0x453   :  { %1118 = vmatpush1.msra.mxu0 %v3240_v18  ;;  %1151 = vmatprep.mubr.f32.mxu0 %v3241_v19 }
 0x454   :  { %1189 = vmatpush1.msra.mxu1 %v3242_v20  ;;  %1222 = vmatprep.mubr.f32.mxu1 %v3241_v19  ;;  %v1804_v20 = vld [vmem:[%s3078_s0 + $0x20] sm:$0xff] }
 0x455   :  { %1285 = vmatprep.subr.mxu0 %v2639_v21  ;;  %1356 = vmatprep.subr.mxu1 %v2642_v22 }
 0x4f4   :  { %v955_v0 = vpop.f32.mrf.mxu0  ;;  %v1026_v56 = vpop.f32.mrf.mxu1 }
 0x4f6   :  { %v957_v52 = vpop.f32.mrf.mxu0  ;;  %v1028_v49 = vpop.f32.mrf.mxu1 }
 0x4f7   :  { %v1035_v54 = vcombine.low %v955_v0, %v957_v52  ;;  %v1036_v45 = vcombine.low %v1026_v56, %v1028_v49 }
 0x4f9   :  { %v1043_v1 = vrot.slane %v1035_v54, %v2415_v62  ;;  %v1050_v18 = vrot.slane %v1036_v45, %v2415_v62 }
 0x4fb   :  { %v1051_v47 = vcombine.low %v1043_v1, %v1050_v18 }
 0x4fd   :  { %v1053_v19 = vadd.f32 %v1804_v20, %v1051_v47  ;;  %v3262_v20 = vld [vmem:[#allocation12_spill] sm:$0xff] }
 0x4ff   :  { %v1805_v46 = vmul.f32 -1.442695, %v1053_v19  ;;  %v1061_v21 = vrot.slane %v1053_v19, 2  ;;  %v1072_v44 = vrot.slane %v1053_v19, 6  ;;  %v1069_v0 = vrot.slane %v1053_v19, 4 }
 0x501   :  { %1944 = vpow2.f32 %v1805_v46  ;;  %v1806_v22 = vmul.f32 -1.442695, %v1061_v21  ;;  %v1807_v43 = vmul.f32 -1.442695, %v1072_v44  ;;  %v3261_v44 = vld [vmem:[#allocation11_spill] sm:$0xff] }
 0x503   :  { %1946 = vpow2.f32 %v1806_v22 }
 0x504   :  { %1948 = vpow2.f32 %v1807_v43 }
 0x50e   :  { %v1945_v42 = vpop.eup %1944 }
 0x50f   :  { %v1057_v49 = vadd.f32 1.0, %v1945_v42 }
 0x510   :  { %v1947_v52 = vpop.eup %1946 }
 0x511   :  { %1950 = vrcp.f32 %v1057_v49  ;;  %v1066_v45 = vadd.f32 1.0, %v1947_v52  ;;  %v1949_v54 = vpop.eup %1948  ;;  %v3264_v49 = vld [vmem:[#allocation14_spill] sm:$0xff]  ;;  %v3265_v52 = vld [vmem:[#allocation15_spill] sm:$0xff] }
 0x512   :  { %1952 = vtanh.f32 %v1069_v0  ;;  %v1077_v18 = vadd.f32 1.0, %v1949_v54  ;;  %v3263_v0 = vld [vmem:[#allocation13_spill] sm:$0xff] }
 0x513   :  { %1954 = vrcp.f32 %v1066_v45  ;;  %v3266_v45 = vld [vmem:[#allocation16_spill] sm:$0xff]  ;;  %v3267_v54 = vld [vmem:[#allocation17_spill] sm:$0xff] }
 0x514   :  { %1956 = vrcp.f32 %v1077_v18  ;;  %v3271_v18 = vld [vmem:[#allocation21_spill] sm:$0xff] }
 0x51e   :  { %v1951_v56 = vpop.eup %1950 }
 0x51f   :  { %v1953_v1 = vpop.eup %1952 }
 0x520   :  { %v1955_v47 = vpop.eup %1954  ;;  %v1081_v21 = vmul.f32 %v1953_v1, %v1951_v56  ;;  %v3268_v56 = vld [vmem:[#allocation18_spill] sm:$0xff]  ;;  %v3269_v1 = vld [vmem:[#allocation19_spill] sm:$0xff] }
 0x521   :  { %v1080_v46 = vmul.f32 %v1955_v47, %v2651_v58  ;;  %v1957_v19 = vpop.eup %1956  ;;  %v3260_v58 = vld [vmem:[#allocation9_spill] sm:$0xff]  ;;  %v3270_v47 = vld [vmem:[#allocation20_spill] sm:$0xff] }
 0x523   :  { %v2846_v22 = vadd.f32 %v1081_v21, %v1080_v46  ;;  %v3272_v46 = vld [vmem:[#allocation22_spill] sm:$0xff]  ;;  %v3273_v21 = vld [vmem:[#allocation23_spill] sm:$0xff] }
 0x525   :  { %1958 = vtanh.f32 %v2846_v22 }
 0x532   :  { %v1959_v42 = vpop.eup %1958 }
 0x533   :  { %v1084_v43 = vmul.f32 %v1959_v42, %v1957_v19  ;;  %v3274_v19 = vld [vmem:[#allocation24_spill] sm:$0xff] }
 0x534   :  { %v2909_v42 = vld [vmem:[#allocation2] sm:$0xff] }
 0x535   :  { %1152 = vmatmul.mubr.f32.vlgmr.msra.gmra.mxu0 %v1084_v43  ;;  %1223 = vmatmul.mubr.f32.vlgmr.msra.gmra.mxu1 %v1084_v43  ;;  %3275 = vst [vmem:[#allocation25_spill] sm:$0xff] %v2909_v42  ;;  %v3276_v43 = vmov 0.0  }
 0x536   :  { %1286 = vmatpush1.msra.mxu0 %v2654_v61  ;;  %1357 = vmatpush1.msra.mxu1 %v2657_v63 }
 0x537   :  { %1287 = vmatprep.subr.mxu0 %v2660_v48  ;;  %1358 = vmatprep.subr.mxu1 %v2663_v2 }
 0x538   :  { %1288 = vmatpush1.msra.mxu0 %v2666_v55  ;;  %1359 = vmatpush1.msra.mxu1 %v2669_v53 }
 0x539   :  { %1289 = vmatprep.subr.mxu0 %v2672_v60  ;;  %1360 = vmatprep.subr.mxu1 %v2675_v59 }
 0x53a   :  { %1290 = vmatpush1.msra.mxu0 %v2678_v57  ;;  %1361 = vmatpush1.msra.mxu1 %v2681_v51 }
 0x53b   :  { %1291 = vmatprep.subr.mxu0 %v2684_v50  ;;  %1362 = vmatprep.subr.mxu1 %v2687_v3 }
 0x53c   :  { %1292 = vmatpush1.msra.mxu0 %v2690_v4  ;;  %1363 = vmatpush1.msra.mxu1 %v2693_v5 }
 0x53d   :  { %1293 = vmatprep.subr.mxu0 %v2696_v6  ;;  %1364 = vmatprep.subr.mxu1 %v2699_v7 }
 0x53e   :  { %1294 = vmatpush1.msra.mxu0 %v2702_v8  ;;  %1365 = vmatpush1.msra.mxu1 %v2705_v9 }
 0x53f   :  { %1295 = vmatprep.subr.mxu0 %v2708_v10  ;;  %1366 = vmatprep.subr.mxu1 %v2711_v11 }
 0x540   :  { %1296 = vmatpush1.msra.mxu0 %v2714_v12  ;;  %1367 = vmatpush1.msra.mxu1 %v2717_v13 }
 0x541   :  { %1297 = vmatprep.subr.mxu0 %v2720_v14  ;;  %1368 = vmatprep.subr.mxu1 %v2723_v15 }
 0x542   :  { %1298 = vmatpush1.msra.mxu0 %v2726_v16  ;;  %1369 = vmatpush1.msra.mxu1 %v2729_v17 }
 0x543   :  { %1299 = vmatprep.subr.mxu0 %v2732_v23  ;;  %1370 = vmatprep.subr.mxu1 %v2735_v24 }
 0x544   :  { %1300 = vmatpush1.msra.mxu0 %v2738_v25  ;;  %1371 = vmatpush1.msra.mxu1 %v2741_v26 }
 0x545   :  { %1301 = vmatprep.subr.mxu0 %v2744_v27  ;;  %1372 = vmatprep.subr.mxu1 %v2747_v28 }
 0x546   :  { %1302 = vmatpush1.msra.mxu0 %v2750_v29  ;;  %1373 = vmatpush1.msra.mxu1 %v2753_v30 }
 0x547   :  { %1303 = vmatprep.subr.mxu0 %v2756_v31  ;;  %1374 = vmatprep.subr.mxu1 %v2759_v32 }
 0x548   :  { %1304 = vmatpush1.msra.mxu0 %v2762_v33  ;;  %1375 = vmatpush1.msra.mxu1 %v2765_v34 }
 0x549   :  { %1305 = vmatprep.subr.mxu0 %v2768_v35  ;;  %1376 = vmatprep.subr.mxu1 %v2771_v36 }
 0x54a   :  { %1306 = vmatpush1.msra.mxu0 %v2774_v37  ;;  %1377 = vmatpush1.msra.mxu1 %v2777_v38 }
 0x54b   :  { %1307 = vmatprep.subr.mxu0 %v2780_v39  ;;  %1378 = vmatprep.subr.mxu1 %v2783_v40 }
 0x54c   :  { %1308 = vmatpush1.msra.mxu0 %v2786_v41  ;;  %1379 = vmatpush1.msra.mxu1 %v3260_v58 }
 0x54d   :  { %1309 = vmatprep.subr.mxu0 %v3261_v44  ;;  %1380 = vmatprep.subr.mxu1 %v3262_v20 }
 0x54e   :  { %1310 = vmatpush1.msra.mxu0 %v3263_v0  ;;  %1381 = vmatpush1.msra.mxu1 %v3264_v49 }
 0x54f   :  { %1311 = vmatprep.subr.mxu0 %v3265_v52  ;;  %1382 = vmatprep.subr.mxu1 %v3266_v45 }
 0x550   :  { %1312 = vmatpush1.msra.mxu0 %v3267_v54  ;;  %1383 = vmatpush1.msra.mxu1 %v3268_v56  ;;  %v2913_v54 = vld [vmem:[#allocation2 + $0x10] sm:$0xff] }
 0x551   :  { %1313 = vmatprep.subr.mxu0 %v3269_v1  ;;  %1384 = vmatprep.subr.mxu1 %v3270_v47  ;;  %3277 = vst [vmem:[#allocation26_spill] sm:$0xff] %v2913_v54  ;;  %v3278_v47 = vld [vmem:[#allocation10_spill] sm:$0xff] }
 0x552   :  { %1314 = vmatpush1.msra.mxu0 %v3271_v18  ;;  %1385 = vmatpush1.msra.mxu1 %v3272_v46  ;;  %v3279_v18 = vld [vmem:[#allocation8_spill] sm:$0xff] }
 0x553   :  { %1315 = vmatprep.subr.mxu0 %v3273_v21  ;;  %1386 = vmatprep.subr.mxu1 %v3274_v19 }
 0x554   :  { %1316 = vmatpush1.msra.mxu0 %v2909_v42  ;;  %1349 = vmatprep.mubr.f32.mxu0 %v3276_v43 }
 0x555   :  { %1387 = vmatpush1.msra.mxu1 %v2913_v54  ;;  %1420 = vmatprep.mubr.f32.mxu1 %v3276_v43  ;;  %v1808_v54 = vld [vmem:[%s3078_s0 + $0x28] sm:$0xff] }
 0x556   :  { %1483 = vmatprep.subr.mxu0 %v3278_v47  ;;  %1554 = vmatprep.subr.mxu1 %v3279_v18 }
 0x5f5   :  { %v1153_v46 = vpop.f32.mrf.mxu0  ;;  %v1224_v21 = vpop.f32.mrf.mxu1 }
 0x5f7   :  { %v1155_v1 = vpop.f32.mrf.mxu0  ;;  %v1226_v19 = vpop.f32.mrf.mxu1 }
 0x5f8   :  { %v1233_v56 = vcombine.low %v1153_v46, %v1155_v1  ;;  %v1234_v45 = vcombine.low %v1224_v21, %v1226_v19 }
 0x5fa   :  { %v1241_v42 = vrot.slane %v1233_v56, %v2415_v62  ;;  %v1248_v52 = vrot.slane %v1234_v45, %v2415_v62 }
 0x5fc   :  { %v1249_v49 = vcombine.low %v1241_v42, %v1248_v52 }
 0x5fe   :  { %v1251_v43 = vadd.f32 %v1808_v54, %v1249_v49 }
 0x600   :  { %v1809_v0 = vmul.f32 -1.442695, %v1251_v43  ;;  %v1259_v47 = vrot.slane %v1251_v43, 2  ;;  %v1270_v20 = vrot.slane %v1251_v43, 6  ;;  %v1267_v1 = vrot.slane %v1251_v43, 4 }
 0x602   :  { %1960 = vpow2.f32 %v1809_v0  ;;  %v1810_v18 = vmul.f32 -1.442695, %v1259_v47  ;;  %v1811_v44 = vmul.f32 -1.442695, %v1270_v20 }
 0x604   :  { %1962 = vpow2.f32 %v1810_v18 }
 0x605   :  { %1964 = vpow2.f32 %v1811_v44 }
 0x60f   :  { %v1961_v58 = vpop.eup %1960 }
 0x610   :  { %v1255_v46 = vadd.f32 1.0, %v1961_v58 }
 0x611   :  { %v1963_v21 = vpop.eup %1962 }
 0x612   :  { %1966 = vrcp.f32 %v1255_v46  ;;  %v1264_v45 = vadd.f32 1.0, %v1963_v21  ;;  %v1965_v56 = vpop.eup %1964  ;;  %v1694_v21 = vld [vmem:[%s3080_s2 + $0x78] sm:$0xff] }
 0x613   :  { %1968 = vtanh.f32 %v1267_v1  ;;  %v1275_v54 = vadd.f32 1.0, %v1965_v56  ;;  %v1692_v56 = vld [vmem:[%s3080_s2 + $0x68] sm:$0xff] }
 0x614   :  { %1970 = vrcp.f32 %v1264_v45  ;;  %v1693_v45 = vld [vmem:[%s3080_s2 + $0x70] sm:$0xff] }
 0x615   :  { %1972 = vrcp.f32 %v1275_v54  ;;  %v1688_v54 = vld [vmem:[%s3080_s2 + $0x48] sm:$0xff] }
 0x61f   :  { %v1967_v19 = vpop.eup %1966 }
 0x620   :  { %v1969_v52 = vpop.eup %1968 }
 0x621   :  { %v1971_v49 = vpop.eup %1970  ;;  %v1279_v42 = vmul.f32 %v1969_v52, %v1967_v19  ;;  %v1691_v19 = vld [vmem:[%s3080_s2 + $0x60] sm:$0xff]  ;;  %v1690_v52 = vld [vmem:[%s3080_s2 + $0x58] sm:$0xff] }
 0x622   :  { %v1278_v0 = vmul.f32 %v1971_v49, %v2846_v22  ;;  %v1973_v58 = vpop.eup %1972  ;;  %v1689_v49 = vld [vmem:[%s3080_s2 + $0x50] sm:$0xff] }
 0x624   :  { %v2925_v47 = vadd.f32 %v1279_v42, %v1278_v0  ;;  %v1687_v0 = vld [vmem:[%s3080_s2 + $0x40] sm:$0xff]  ;;  %v1686_v42 = vld [vmem:[%s3080_s2 + $0x38] sm:$0xff] }
 0x626   :  { %1974 = vtanh.f32 %v2925_v47 }
 0x633   :  { %v1975_v20 = vpop.eup %1974 }
 0x634   :  { %v1282_v44 = vmul.f32 %v1975_v20, %v1973_v58  ;;  %v1684_v58 = vld [vmem:[%s3080_s2 + $0x28] sm:$0xff]  ;;  %v1683_v20 = vld [vmem:[%s3080_s2 + $0x20] sm:$0xff] }
 0x636   :  { %1350 = vmatmul.mubr.f32.vlgmr.msra.gmra.mxu0 %v1282_v44  ;;  %1421 = vmatmul.mubr.f32.vlgmr.msra.gmra.mxu1 %v1282_v44  ;;  %v1682_v44 = vld [vmem:[%s3080_s2 + $0x18] sm:$0xff] }
 0x637   :  { %1484 = vmatpush1.msra.mxu0 %v2654_v61  ;;  %1555 = vmatpush1.msra.mxu1 %v2657_v63  ;;  %v3280_v61 = vld [vmem:[#allocation9_spill] sm:$0xff]  ;;  %v3281_v63 = vld [vmem:[#allocation11_spill] sm:$0xff] }
 0x638   :  { %1485 = vmatprep.subr.mxu0 %v2660_v48  ;;  %1556 = vmatprep.subr.mxu1 %v2663_v2  ;;  %v3282_v48 = vld [vmem:[#allocation12_spill] sm:$0xff]  ;;  %v3283_v2 = vld [vmem:[#allocation13_spill] sm:$0xff] }
 0x639   :  { %1486 = vmatpush1.msra.mxu0 %v2666_v55  ;;  %1557 = vmatpush1.msra.mxu1 %v2669_v53  ;;  %v3284_v55 = vld [vmem:[#allocation14_spill] sm:$0xff]  ;;  %v3285_v53 = vld [vmem:[#allocation15_spill] sm:$0xff] }
 0x63a   :  { %1487 = vmatprep.subr.mxu0 %v2672_v60  ;;  %1558 = vmatprep.subr.mxu1 %v2675_v59  ;;  %v3286_v60 = vld [vmem:[#allocation16_spill] sm:$0xff]  ;;  %v3287_v59 = vld [vmem:[#allocation17_spill] sm:$0xff] }
 0x63b   :  { %1488 = vmatpush1.msra.mxu0 %v2678_v57  ;;  %1559 = vmatpush1.msra.mxu1 %v2681_v51  ;;  %v3288_v57 = vld [vmem:[#allocation18_spill] sm:$0xff]  ;;  %v3289_v51 = vld [vmem:[#allocation19_spill] sm:$0xff] }
 0x63c   :  { %1489 = vmatprep.subr.mxu0 %v2684_v50  ;;  %1560 = vmatprep.subr.mxu1 %v2687_v3  ;;  %v3290_v50 = vld [vmem:[#allocation20_spill] sm:$0xff]  ;;  %v3291_v3 = vld [vmem:[#allocation21_spill] sm:$0xff] }
 0x63d   :  { %1490 = vmatpush1.msra.mxu0 %v2690_v4  ;;  %1561 = vmatpush1.msra.mxu1 %v2693_v5  ;;  %v3292_v4 = vld [vmem:[#allocation22_spill] sm:$0xff]  ;;  %v3293_v5 = vld [vmem:[#allocation23_spill] sm:$0xff] }
 0x63e   :  { %1491 = vmatprep.subr.mxu0 %v2696_v6  ;;  %1562 = vmatprep.subr.mxu1 %v2699_v7  ;;  %v3294_v6 = vld [vmem:[#allocation24_spill] sm:$0xff]  ;;  %v3295_v7 = vld [vmem:[#allocation25_spill] sm:$0xff] }
 0x63f   :  { %1492 = vmatpush1.msra.mxu0 %v2702_v8  ;;  %1563 = vmatpush1.msra.mxu1 %v2705_v9  ;;  %v3296_v8 = vmov 0.0   ;;  %v3297_v9 = vld [vmem:[#allocation26_spill] sm:$0xff] }
 0x640   :  { %1493 = vmatprep.subr.mxu0 %v2708_v10  ;;  %1564 = vmatprep.subr.mxu1 %v2711_v11 }
 0x641   :  { %1494 = vmatpush1.msra.mxu0 %v2714_v12  ;;  %1565 = vmatpush1.msra.mxu1 %v2717_v13 }
 0x642   :  { %1495 = vmatprep.subr.mxu0 %v2720_v14  ;;  %1566 = vmatprep.subr.mxu1 %v2723_v15 }
 0x643   :  { %1496 = vmatpush1.msra.mxu0 %v2726_v16  ;;  %1567 = vmatpush1.msra.mxu1 %v2729_v17 }
 0x644   :  { %1497 = vmatprep.subr.mxu0 %v2732_v23  ;;  %1568 = vmatprep.subr.mxu1 %v2735_v24  ;;  %v1812_v23 = vld [vmem:[%s3078_s0 + $0x30] sm:$0xff] }
 0x645   :  { %1498 = vmatpush1.msra.mxu0 %v2738_v25  ;;  %1569 = vmatpush1.msra.mxu1 %v2741_v26 }
 0x646   :  { %1499 = vmatprep.subr.mxu0 %v2744_v27  ;;  %1570 = vmatprep.subr.mxu1 %v2747_v28 }
 0x647   :  { %1500 = vmatpush1.msra.mxu0 %v2750_v29  ;;  %1571 = vmatpush1.msra.mxu1 %v2753_v30 }
 0x648   :  { %1501 = vmatprep.subr.mxu0 %v2756_v31  ;;  %1572 = vmatprep.subr.mxu1 %v2759_v32 }
 0x649   :  { %1502 = vmatpush1.msra.mxu0 %v2762_v33  ;;  %1573 = vmatpush1.msra.mxu1 %v2765_v34 }
 0x64a   :  { %1503 = vmatprep.subr.mxu0 %v2768_v35  ;;  %1574 = vmatprep.subr.mxu1 %v2771_v36 }
 0x64b   :  { %1504 = vmatpush1.msra.mxu0 %v2774_v37  ;;  %1575 = vmatpush1.msra.mxu1 %v2777_v38 }
 0x64c   :  { %1505 = vmatprep.subr.mxu0 %v2780_v39  ;;  %1576 = vmatprep.subr.mxu1 %v2783_v40 }
 0x64d   :  { %1506 = vmatpush1.msra.mxu0 %v2786_v41  ;;  %1577 = vmatpush1.msra.mxu1 %v3280_v61  ;;  %v1681_v61 = vld [vmem:[%s3080_s2 + $0x10] sm:$0xff] }
 0x64e   :  { %1507 = vmatprep.subr.mxu0 %v3281_v63  ;;  %1578 = vmatprep.subr.mxu1 %v3282_v48  ;;  %v1680_v63 = vld [vmem:[%s3080_s2 + $0x8] sm:$0xff]  ;;  %v1679_v48 = vld [vmem:[%s3080_s2] sm:$0xff] }
 0x64f   :  { %1508 = vmatpush1.msra.mxu0 %v3283_v2  ;;  %1579 = vmatpush1.msra.mxu1 %v3284_v55 }
 0x650   :  { %1509 = vmatprep.subr.mxu0 %v3285_v53  ;;  %1580 = vmatprep.subr.mxu1 %v3286_v60 }
 0x651   :  { %1510 = vmatpush1.msra.mxu0 %v3287_v59  ;;  %1581 = vmatpush1.msra.mxu1 %v3288_v57 }
 0x652   :  { %1511 = vmatprep.subr.mxu0 %v3289_v51  ;;  %1582 = vmatprep.subr.mxu1 %v3290_v50 }
 0x653   :  { %1512 = vmatpush1.msra.mxu0 %v3291_v3  ;;  %1583 = vmatpush1.msra.mxu1 %v3292_v4  ;;  %v1816_v3 = vld [vmem:[%s3078_s0 + $0x38] sm:$0xff] }
 0x654   :  { %1513 = vmatprep.subr.mxu0 %v3293_v5  ;;  %1584 = vmatprep.subr.mxu1 %v3294_v6 }
 0x655   :  { %1514 = vmatpush1.msra.mxu0 %v3295_v7  ;;  %1547 = vmatprep.mubr.f32.mxu0 %v3296_v8 }
 0x656   :  { %1585 = vmatpush1.msra.mxu1 %v3297_v9  ;;  %1618 = vmatprep.mubr.f32.mxu1 %v3296_v8 }
 0x657   :  { %1838 = vmatprep.subr.mxu0 %v3296_v8 }
 0x6f6   :  { %v1351_v10 = vpop.f32.mrf.mxu0  ;;  %v1422_v11 = vpop.f32.mrf.mxu1 }
 0x6f8   :  { %v1353_v12 = vpop.f32.mrf.mxu0  ;;  %v1424_v13 = vpop.f32.mrf.mxu1 }
 0x6f9   :  { %v1431_v14 = vcombine.low %v1351_v10, %v1353_v12  ;;  %v1432_v15 = vcombine.low %v1422_v11, %v1424_v13 }
 0x6fb   :  { %v1439_v16 = vrot.slane %v1431_v14, %v2415_v62  ;;  %v1446_v17 = vrot.slane %v1432_v15, %v2415_v62 }
 0x6fd   :  { %v1447_v24 = vcombine.low %v1439_v16, %v1446_v17 }
 0x6ff   :  { %v1449_v25 = vadd.f32 %v1812_v23, %v1447_v24 }
 0x701   :  { %v1813_v26 = vmul.f32 -1.442695, %v1449_v25  ;;  %v1457_v27 = vrot.slane %v1449_v25, 2  ;;  %v1468_v29 = vrot.slane %v1449_v25, 6  ;;  %v1465_v32 = vrot.slane %v1449_v25, 4 }
 0x703   :  { %1976 = vpow2.f32 %v1813_v26  ;;  %v1814_v28 = vmul.f32 -1.442695, %v1457_v27  ;;  %v1815_v30 = vmul.f32 -1.442695, %v1468_v29 }
 0x705   :  { %1978 = vpow2.f32 %v1814_v28 }
 0x706   :  { %1980 = vpow2.f32 %v1815_v30 }
 0x710   :  { %v1977_v31 = vpop.eup %1976 }
 0x711   :  { %v1453_v33 = vadd.f32 1.0, %v1977_v31  ;;  %v1820_v31 = vld [vmem:[%s3081_s3] ss:$0 sm:$0xff] }
 0x712   :  { %v1979_v34 = vpop.eup %1978 }
 0x713   :  { %1982 = vrcp.f32 %v1453_v33  ;;  %v1462_v35 = vadd.f32 1.0, %v1979_v34  ;;  %v1981_v36 = vpop.eup %1980 }
 0x714   :  { %1984 = vtanh.f32 %v1465_v32  ;;  %v1473_v40 = vadd.f32 1.0, %v1981_v36 }
 0x715   :  { %1986 = vrcp.f32 %v1462_v35 }
 0x716   :  { %1988 = vrcp.f32 %v1473_v40 }
 0x720   :  { %v1983_v37 = vpop.eup %1982 }
 0x721   :  { %v1985_v38 = vpop.eup %1984 }
 0x722   :  { %v1987_v39 = vpop.eup %1986  ;;  %v1477_v22 = vmul.f32 %v1985_v38, %v1983_v37 }
 0x723   :  { %v1476_v41 = vmul.f32 %v1987_v39, %v2925_v47  ;;  %v1989_v18 = vpop.eup %1988  ;;  %v1685_v47 = vld [vmem:[%s3080_s2 + $0x30] sm:$0xff] }
 0x725   :  { %v2999_v43 = vadd.f32 %v1477_v22, %v1476_v41 }
 0x727   :  { %1990 = vtanh.f32 %v2999_v43 }
 0x734   :  { %v1991_v1 = vpop.eup %1990 }
 0x735   :  { %v1480_v46 = vmul.f32 %v1991_v1, %v1989_v18 }
 0x737   :  { %1548 = vmatmul.mubr.f32.vlgmr.msra.gmra.mxu0 %v1480_v46  ;;  %1619 = vmatmul.mubr.f32.vlgmr.msra.gmra.mxu1 %v1480_v46 }
 0x738   :  { %1839 = vmatpush3.msra.mxu0 %v1694_v21  ;;  %1870 = vmatprep.mubr.msk.f32.mxu0 %vm2121_vm0, %v3296_v8 }
 0x739   :  { %1840 = vmatprep.subr.mxu0 %v3296_v8 }
 0x73a   :  { %1841 = vmatpush3.msra.mxu0 %v1693_v45 }
 0x73b   :  { %1842 = vmatprep.subr.mxu0 %v3296_v8 }
 0x73c   :  { %1843 = vmatpush3.msra.mxu0 %v1692_v56 }
 0x73d   :  { %1844 = vmatprep.subr.mxu0 %v3296_v8 }
 0x73e   :  { %1845 = vmatpush3.msra.mxu0 %v1691_v19 }
 0x73f   :  { %1846 = vmatprep.subr.mxu0 %v3296_v8 }
 0x740   :  { %1847 = vmatpush3.msra.mxu0 %v1690_v52 }
 0x741   :  { %1848 = vmatprep.subr.mxu0 %v3296_v8 }
 0x742   :  { %1849 = vmatpush3.msra.mxu0 %v1689_v49 }
 0x743   :  { %1850 = vmatprep.subr.mxu0 %v3296_v8 }
 0x744   :  { %1851 = vmatpush3.msra.mxu0 %v1688_v54 }
 0x745   :  { %1852 = vmatprep.subr.mxu0 %v3296_v8 }
 0x746   :  { %1853 = vmatpush3.msra.mxu0 %v1687_v0 }
 0x747   :  { %1854 = vmatprep.subr.mxu0 %v3296_v8 }
 0x748   :  { %1855 = vmatpush3.msra.mxu0 %v1686_v42 }
 0x749   :  { %1856 = vmatprep.subr.mxu0 %v3296_v8 }
 0x74a   :  { %1857 = vmatpush3.msra.mxu0 %v1685_v47 }
 0x74b   :  { %1858 = vmatprep.subr.mxu0 %v3296_v8 }
 0x74c   :  { %1859 = vmatpush3.msra.mxu0 %v1684_v58 }
 0x74d   :  { %1860 = vmatprep.subr.mxu0 %v3296_v8 }
 0x74e   :  { %1861 = vmatpush3.msra.mxu0 %v1683_v20 }
 0x74f   :  { %1862 = vmatprep.subr.mxu0 %v3296_v8 }
 0x750   :  { %1863 = vmatpush3.msra.mxu0 %v1682_v44 }
 0x751   :  { %1864 = vmatprep.subr.mxu0 %v3296_v8 }
 0x752   :  { %1865 = vmatpush3.msra.mxu0 %v1681_v61 }
 0x753   :  { %1866 = vmatprep.subr.mxu0 %v3296_v8 }
 0x754   :  { %1867 = vmatpush3.msra.mxu0 %v1680_v63 }
 0x755   :  { %1868 = vmatprep.subr.mxu0 %v3296_v8 }
 0x756   :  { %1869 = vmatpush3.msra.mxu0 %v1679_v48 }
 0x7f7   :  { %v1549_v2 = vpop.f32.mrf.mxu0  ;;  %v1620_v55 = vpop.f32.mrf.mxu1 }
 0x7f9   :  { %v1551_v53 = vpop.f32.mrf.mxu0  ;;  %v1622_v60 = vpop.f32.mrf.mxu1 }
 0x7fa   :  { %v1629_v59 = vcombine.low %v1549_v2, %v1551_v53  ;;  %v1630_v57 = vcombine.low %v1620_v55, %v1622_v60 }
 0x7fc   :  { %v1637_v51 = vrot.slane %v1629_v59, %v2415_v62  ;;  %v1644_v50 = vrot.slane %v1630_v57, %v2415_v62 }
 0x7fe   :  { %v1645_v4 = vcombine.low %v1637_v51, %v1644_v50 }
 0x800   :  { %v1647_v5 = vadd.f32 %v1816_v3, %v1645_v4 }
 0x802   :  { %v1817_v6 = vmul.f32 -1.442695, %v1647_v5  ;;  %v1655_v7 = vrot.slane %v1647_v5, 2  ;;  %v1666_v9 = vrot.slane %v1647_v5, 6  ;;  %v1663_v12 = vrot.slane %v1647_v5, 4 }
 0x804   :  { %1992 = vpow2.f32 %v1817_v6  ;;  %v1818_v8 = vmul.f32 -1.442695, %v1655_v7  ;;  %v1819_v10 = vmul.f32 -1.442695, %v1666_v9 }
 0x806   :  { %1994 = vpow2.f32 %v1818_v8 }
 0x807   :  { %1996 = vpow2.f32 %v1819_v10 }
 0x811   :  { %v1993_v11 = vpop.eup %1992 }
 0x812   :  { %v1651_v13 = vadd.f32 1.0, %v1993_v11 }
 0x813   :  { %v1995_v14 = vpop.eup %1994 }
 0x814   :  { %1998 = vrcp.f32 %v1651_v13  ;;  %v1660_v62 = vadd.f32 1.0, %v1995_v14  ;;  %v1997_v15 = vpop.eup %1996 }
 0x815   :  { %2000 = vtanh.f32 %v1663_v12  ;;  %v1671_v24 = vadd.f32 1.0, %v1997_v15 }
 0x816   :  { %2002 = vrcp.f32 %v1660_v62 }
 0x817   :  { %2004 = vrcp.f32 %v1671_v24 }
 0x821   :  { %v1999_v16 = vpop.eup %1998 }
 0x822   :  { %v2001_v17 = vpop.eup %2000 }
 0x823   :  { %v2003_v23 = vpop.eup %2002  ;;  %v1675_v26 = vmul.f32 %v2001_v17, %v1999_v16 }
 0x824   :  { %v1674_v25 = vmul.f32 %v2003_v23, %v2999_v43  ;;  %v2005_v28 = vpop.eup %2004 }
 0x826   :  { %v1676_v27 = vadd.f32 %v1675_v26, %v1674_v25 }
 0x828   :  { %2006 = vtanh.f32 %v1676_v27 }
 0x835   :  { %v2007_v29 = vpop.eup %2006 }
 0x836   :  { %v1678_v30 = vmul.f32 %v2007_v29, %v2005_v28 }
 0x838   :  { %1871 = vmatmul.mubr.f32.vlgmr.msra.gmra.mxu0 %v1678_v30 }
 0x8f8   :  { %v1768_v32 = vpop.f32.mrf.mxu0 }
 0x8f9   :  { %v1769_v33 = vadd.f32 %v1820_v31, %v1768_v32 }
 0x8fa   :  { %v1872_v34 = vpop.f32.mrf.mxu0 }
 0x8fb   :  { %1773 = vst.msk [vmem:[#allocation5] sm:$0x3] %vm1772_vm1, %v1769_v33 }
 0x8fc   :  { %2103 = shalt.err (!%p2100_p9)
}
 0x8fd   :  { %1783 = dma.vmem_to_hbm [thread:$0]  %s1781_s17, 32, %s3082_s4, [#allocation4]  }
 0x8fe   :  { %2114 = dma.done.wait [#allocation4], 32  }
 0x8ff   :  { %2115 = vsyncadd [#allocation4], 4294967264 }
 0x900   :  { %1787 = vsyncpa [#allocation3], 1 }
 0x901   :  { %1788 = vsyncpa [#allocation4], 1 }

</bundles_post_ra>
